<compile_context>
chip_gen: v6e
topology: v6e:2x2x1
jax: 0.10.0
libtpu: 0.0.40
codegen_flags: <defaults>
</compile_context>

<pallas_src>
import functools
import math

import numpy as np
import jax
import jax.numpy as jnp
from jax.experimental import pallas as pl
from jax.experimental.pallas import tpu as pltpu


def _text_encoder_kernel(
    wx_ref, px_ref, lens_ref,
    a_ref, pw_ref, c_ref,
    whh_ref, bhhn_ref, h0_ref,
    wo1_ref, bo1_ref, g_ref, beta_ref, wo2_ref, bo2_ref,
    o_ref,
    *, T, B, H,
):
    # wx_ref:   (T*B, W)   word embeddings, time-major flattened (row = t*B + b)
    # px_ref:   (T*B, P)   positional one-hots, same layout
    # lens_ref: (B, 1)     int32 caption lengths
    # a_ref:    (W, 6H)    folded We^T @ [Wih_f^T | Wih_b^T]
    # pw_ref:   (P, 6H)    folded Wp^T @ We^T @ [Wih_f^T | Wih_b^T]
    # c_ref:    (1, 6H)    folded input-side bias (+ recurrent r/z biases)
    # whh_ref:  (2H, 6H)   block-diag(W_hh_fwd^T, W_hh_bwd^T)
    # bhhn_ref: (1, 2H)    [b_hn_fwd | b_hn_bwd] (the only bias needed per step)
    # h0_ref:   (1, 2H)    [h0_fwd | h0_bwd]
    # wo1_ref:  (2H, H)    output_net Linear1^T     bo1_ref: (1, H)
    # g_ref/beta_ref: (1, H) LayerNorm affine
    # wo2_ref:  (H, O)     output_net Linear2^T     bo2_ref: (1, O)
    # o_ref:    (B, O)
    def mm(a, w):
        return jnp.dot(a, w, preferred_element_type=jnp.float32)

    H3 = 3 * H

    # ---- Fused input-side gate pre-activations, both directions at once ----
    gi = mm(wx_ref[...], a_ref[...]) + mm(px_ref[...], pw_ref[...]) + c_ref[...]  # (T*B, 6H)
    gi_f = gi[:, :H3]                                                  # forward dir
    gi_b = gi[:, H3:]                                                  # backward dir

    lens = lens_ref[...]                                               # (B, 1) int32
    h = jnp.broadcast_to(h0_ref[...], (B, 2 * H))                      # [h_fwd | h_bwd]
    whh = whh_ref[...]                                                 # hoisted, loop-invariant
    bhhn = bhhn_ref[...]
    bn_f = bhhn[:, :H]
    bn_b = bhhn[:, H:]

    def cell(gi_t, gh_t, bn, h_prev):
        # PyTorch GRU gate order r, z, n;  r/z recurrent biases already folded into gi.
        r = jax.nn.sigmoid(gi_t[:, :H] + gh_t[:, :H])
        z = jax.nn.sigmoid(gi_t[:, H:2 * H] + gh_t[:, H:2 * H])
        n = jnp.tanh(gi_t[:, 2 * H:] + r * (gh_t[:, 2 * H:] + bn))
        return (1.0 - z) * n + z * h_prev

    # Sequential recurrence: forward and reversed directions advance together;
    # their hidden-side projections are fused into one block-diagonal matmul.
    # pack_padded_sequence semantics: only update a sample's hidden while
    # t < cap_len (forward) / tb < cap_len (backward).
    # TODO(synk): for long T, replace the static unroll with lax.fori_loop over
    # a time-major (T, B, 6H) VMEM scratch holding `gi`.
    for t in range(T):
        tb = T - 1 - t
        gh = mm(h, whh)                                                # (B, 6H)
        hf_new = cell(gi_f[t * B:(t + 1) * B], gh[:, :H3], bn_f, h[:, :H])
        hb_new = cell(gi_b[tb * B:(tb + 1) * B], gh[:, H3:], bn_b, h[:, H:])
        hf = jnp.where(t < lens, hf_new, h[:, :H])
        hb = jnp.where(tb < lens, hb_new, h[:, H:])
        h = jnp.concatenate([hf, hb], axis=-1)                         # (B, 2H)

    # ---- output_net: Linear -> LayerNorm -> LeakyReLU(0.2) -> Linear ----
    y = mm(h, wo1_ref[...]) + bo1_ref[...]                             # (B, H)
    mu = jnp.mean(y, axis=-1, keepdims=True)
    var = jnp.mean(jnp.square(y - mu), axis=-1, keepdims=True)
    y = (y - mu) * jax.lax.rsqrt(var + 1e-5)
    y = y * g_ref[...] + beta_ref[...]
    y = jnp.where(y >= 0, y, 0.2 * y)
    o_ref[...] = mm(y, wo2_ref[...]) + bo2_ref[...]                    # single store


def text_encoder_bigru_co(word_embs, pos_onehot, cap_lens, params):
    """word_embs: (B,T,W); pos_onehot: (B,T,P); cap_lens: (B,) int."""
    B, T, W = word_embs.shape
    P = pos_onehot.shape[-1]
    H = params["we"].shape[0]
    O = params["wo2"].shape[0]

    # Layout glue: time-major flatten so time step t occupies rows [t*B, (t+1)*B).
    wx = jnp.transpose(word_embs, (1, 0, 2)).reshape(T * B, W)
    px = jnp.transpose(pos_onehot, (1, 0, 2)).reshape(T * B, P)
    lens = cap_lens.reshape(B, 1).astype(jnp.int32)

    # ---- Pre-fold the entire input side into two lane-dense weight slabs ----
    # gi = word @ (We^T Wih) + pos @ (Wp^T We^T Wih) + c
    wih_cat = jnp.concatenate([params["wih_f"].T, params["wih_b"].T], axis=1)      # (H, 6H)
    bih_cat = jnp.concatenate([params["bih_f"], params["bih_b"]])                  # (6H,)
    a_slab = params["we"].T @ wih_cat                                              # (W, 6H)
    p_slab = params["wp"].T @ a_slab                                               # (P, 6H)
    c_bias = (params["bp"] @ params["we"].T + params["be"]) @ wih_cat + bih_cat    # (6H,)
    # Fold the recurrent r/z biases into the constant; only b_hn stays per-step.
    zeros_h = jnp.zeros((H,), jnp.float32)
    c_bias = c_bias + jnp.concatenate([
        params["bhh_f"][:2 * H], zeros_h, params["bhh_b"][:2 * H], zeros_h])
    bhhn = jnp.concatenate([params["bhh_f"][2 * H:], params["bhh_b"][2 * H:]]).reshape(1, 2 * H)

    # Block-diagonal hidden-side weight: one matmul per step drives both directions.
    whh_blk = jnp.zeros((2 * H, 6 * H), jnp.float32)
    whh_blk = whh_blk.at[:H, :3 * H].set(params["whh_f"].T)
    whh_blk = whh_blk.at[H:, 3 * H:].set(params["whh_b"].T)
    h0_cat = jnp.concatenate([params["h0"][0, 0], params["h0"][1, 0]]).reshape(1, 2 * H)

    args = (
        wx, px, lens,
        a_slab, p_slab, c_bias.reshape(1, 6 * H),
        whh_blk, bhhn, h0_cat,
        params["wo1"].T, params["bo1"].reshape(1, H),
        params["gamma"].reshape(1, H), params["beta"].reshape(1, H),
        params["wo2"].T, params["bo2"].reshape(1, O),
    )

    return pl.pallas_call(
        functools.partial(_text_encoder_kernel, T=T, B=B, H=H),
        out_shape=jax.ShapeDtypeStruct((B, O), jnp.float32),
        in_specs=[pl.BlockSpec(memory_space=pltpu.MemorySpace.VMEM) for _ in args],
        out_specs=pl.BlockSpec(memory_space=pltpu.MemorySpace.VMEM),
    )(*args)


# --------------------------- numpy reference ---------------------------------
def _ref_forward(word, pos, lens, p):
    B, T, _ = word.shape
    H = p["we"].shape[0]

    def sig(v):
        return 1.0 / (1.0 + np.exp(-v))

    inp = word + pos @ p["wp"].T + p["bp"]
    x = inp @ p["we"].T + p["be"]                                      # (B, T, H)

    def run(xs, wih, whh, bih, bhh, h):
        for xt in xs:
            gi = wih @ xt + bih
            gh = whh @ h + bhh
            r = sig(gi[:H] + gh[:H])
            z = sig(gi[H:2 * H] + gh[H:2 * H])
            n = np.tanh(gi[2 * H:] + r * gh[2 * H:])
            h = (1.0 - z) * n + z * h
        return h

    outs = []
    for b in range(B):
        L = int(lens[b])
        hf = run(list(x[b, :L]), p["wih_f"], p["whh_f"], p["bih_f"], p["bhh_f"],
                 p["h0"][0, 0].astype(np.float64))
        hb = run(list(x[b, :L][::-1]), p["wih_b"], p["whh_b"], p["bih_b"], p["bhh_b"],
                 p["h0"][1, 0].astype(np.float64))
        g = np.concatenate([hf, hb])
        y = p["wo1"] @ g + p["bo1"]
        mu = y.mean()
        var = ((y - mu) ** 2).mean()
        y = (y - mu) / np.sqrt(var + 1e-5) * p["gamma"] + p["beta"]
        y = np.where(y >= 0, y, 0.2 * y)
        outs.append(p["wo2"] @ y + p["bo2"])
    return np.stack(outs).astype(np.float32)


if __name__ == "__main__":
    B, T = 2, 8
    word_size, pos_size, hidden_size, output_size = 32, 16, 32, 16
    H = hidden_size

    key = jax.random.PRNGKey(0)
    ks = jax.random.split(key, 21)

    def xavier(k, out_dim, in_dim):
        std = math.sqrt(2.0 / (in_dim + out_dim))
        return jax.random.normal(k, (out_dim, in_dim), jnp.float32) * std

    gru_std = 1.0 / math.sqrt(H)

    word_embs = jax.random.normal(ks[0], (B, T, word_size), jnp.float32)
    pos_ids = jnp.tile(jnp.arange(T) % pos_size, (B, 1))
    pos_onehot = jax.nn.one_hot(pos_ids, pos_size, dtype=jnp.float32)
    cap_lens = jnp.array([T, T - 3], dtype=jnp.int32)   # sorted descending (pack_padded_sequence)

    params = {
        "wp": xavier(ks[1], word_size, pos_size),
        "bp": 0.1 * jax.random.normal(ks[2], (word_size,), jnp.float32),
        "we": xavier(ks[3], hidden_size, word_size),
        "be": 0.1 * jax.random.normal(ks[4], (hidden_size,), jnp.float32),
        "wih_f": gru_std * jax.random.normal(ks[5], (3 * H, H), jnp.float32),
        "whh_f": gru_std * jax.random.normal(ks[6], (3 * H, H), jnp.float32),
        "bih_f": gru_std * jax.random.normal(ks[7], (3 * H,), jnp.float32),
        "bhh_f": gru_std * jax.random.normal(ks[8], (3 * H,), jnp.float32),
        "wih_b": gru_std * jax.random.normal(ks[9], (3 * H, H), jnp.float32),
        "whh_b": gru_std * jax.random.normal(ks[10], (3 * H, H), jnp.float32),
        "bih_b": gru_std * jax.random.normal(ks[11], (3 * H,), jnp.float32),
        "bhh_b": gru_std * jax.random.normal(ks[12], (3 * H,), jnp.float32),
        "h0": jax.random.normal(ks[13], (2, 1, H), jnp.float32),
        "wo1": xavier(ks[14], hidden_size, 2 * hidden_size),
        "bo1": 0.1 * jax.random.normal(ks[15], (hidden_size,), jnp.float32),
        "gamma": 1.0 + 0.1 * jax.random.normal(ks[16], (hidden_size,), jnp.float32),
        "beta": 0.1 * jax.random.normal(ks[17], (hidden_size,), jnp.float32),
        "wo2": xavier(ks[18], output_size, hidden_size),
        "bo2": 0.1 * jax.random.normal(ks[19], (output_size,), jnp.float32),
    }

    out = text_encoder_bigru_co(word_embs, pos_onehot, cap_lens, params)
    out = jax.block_until_ready(out)

    ref = _ref_forward(
        np.asarray(word_embs, np.float64), np.asarray(pos_onehot, np.float64),
        np.asarray(cap_lens), {k: np.asarray(v, np.float64) for k, v in params.items()})

    assert out.shape == (B, output_size), out.shape
    np.testing.assert_allclose(np.asarray(out), ref, rtol=5e-4, atol=5e-4)
    print("KERNEL_OK")
</pallas_src>

<mosaic_0001>
module attributes {stable_mosaic.version = 11 : i64} {
  func.func @_text_encoder_kernel(%arg0: memref<16x32xf32, #tpu.memory_space<vmem>>, %arg1: memref<16x16xf32, #tpu.memory_space<vmem>>, %arg2: memref<2x1xi32, #tpu.memory_space<vmem>>, %arg3: memref<32x192xf32, #tpu.memory_space<vmem>>, %arg4: memref<16x192xf32, #tpu.memory_space<vmem>>, %arg5: memref<1x192xf32, #tpu.memory_space<vmem>>, %arg6: memref<64x192xf32, #tpu.memory_space<vmem>>, %arg7: memref<1x64xf32, #tpu.memory_space<vmem>>, %arg8: memref<1x64xf32, #tpu.memory_space<vmem>>, %arg9: memref<64x32xf32, #tpu.memory_space<vmem>>, %arg10: memref<1x32xf32, #tpu.memory_space<vmem>>, %arg11: memref<1x32xf32, #tpu.memory_space<vmem>>, %arg12: memref<1x32xf32, #tpu.memory_space<vmem>>, %arg13: memref<32x16xf32, #tpu.memory_space<vmem>>, %arg14: memref<1x16xf32, #tpu.memory_space<vmem>>, %arg15: memref<2x16xf32, #tpu.memory_space<vmem>>) attributes {dimension_semantics = [], scalar_prefetch = 0 : i64, scratch_operands = 0 : i64, tpu.core_type = #tpu.core_type<tc>} {
    %c0 = arith.constant 0 : index
    %c0_0 = arith.constant 0 : index
    %0 = vector.load %arg0[%c0, %c0_0] : memref<16x32xf32, #tpu.memory_space<vmem>>, vector<16x32xf32>
    %c0_1 = arith.constant 0 : index
    %c0_2 = arith.constant 0 : index
    %1 = vector.load %arg3[%c0_1, %c0_2] : memref<32x192xf32, #tpu.memory_space<vmem>>, vector<32x192xf32>
    %cst = arith.constant dense<0.000000e+00> : vector<16x192xf32>
    %2 = tpu.matmul %0, %1, %cst {dimension_numbers = #tpu.dot_dimension_numbers<[1], [0], [0], [1], [0, 0, 1, 1], [], []>} : vector<16x32xf32>, vector<32x192xf32>, vector<16x192xf32> -> vector<16x192xf32>
    %c0_3 = arith.constant 0 : index
    %c0_4 = arith.constant 0 : index
    %3 = vector.load %arg1[%c0_3, %c0_4] : memref<16x16xf32, #tpu.memory_space<vmem>>, vector<16x16xf32>
    %c0_5 = arith.constant 0 : index
    %c0_6 = arith.constant 0 : index
    %4 = vector.load %arg4[%c0_5, %c0_6] : memref<16x192xf32, #tpu.memory_space<vmem>>, vector<16x192xf32>
    %cst_7 = arith.constant dense<0.000000e+00> : vector<16x192xf32>
    %5 = tpu.matmul %3, %4, %cst_7 {dimension_numbers = #tpu.dot_dimension_numbers<[1], [0], [0], [1], [0, 0, 1, 1], [], []>} : vector<16x16xf32>, vector<16x192xf32>, vector<16x192xf32> -> vector<16x192xf32>
    %6 = arith.addf %2, %5 : vector<16x192xf32>
    %c0_8 = arith.constant 0 : index
    %c0_9 = arith.constant 0 : index
    %7 = vector.load %arg5[%c0_8, %c0_9] : memref<1x192xf32, #tpu.memory_space<vmem>>, vector<1x192xf32>
    %8 = vector.broadcast %7 : vector<1x192xf32> to vector<16x192xf32>
    %9 = arith.addf %6, %8 : vector<16x192xf32>
    %10 = vector.extract_strided_slice %9 {offsets = [0, 0], sizes = [16, 96], strides = [1, 1]} : vector<16x192xf32> to vector<16x96xf32>
    %11 = vector.extract_strided_slice %9 {offsets = [0, 96], sizes = [16, 96], strides = [1, 1]} : vector<16x192xf32> to vector<16x96xf32>
    %c0_10 = arith.constant 0 : index
    %c0_11 = arith.constant 0 : index
    %12 = vector.load %arg2[%c0_10, %c0_11] : memref<2x1xi32, #tpu.memory_space<vmem>>, vector<2x1xi32>
    %c0_12 = arith.constant 0 : index
    %c0_13 = arith.constant 0 : index
    %13 = vector.load %arg8[%c0_12, %c0_13] : memref<1x64xf32, #tpu.memory_space<vmem>>, vector<1x64xf32>
    %14 = vector.shape_cast %13 : vector<1x64xf32> to vector<1x64xf32>
    %15 = vector.broadcast %14 : vector<1x64xf32> to vector<2x64xf32>
    %c0_14 = arith.constant 0 : index
    %c0_15 = arith.constant 0 : index
    %16 = vector.load %arg6[%c0_14, %c0_15] : memref<64x192xf32, #tpu.memory_space<vmem>>, vector<64x192xf32>
    %c0_16 = arith.constant 0 : index
    %c0_17 = arith.constant 0 : index
    %17 = vector.load %arg7[%c0_16, %c0_17] : memref<1x64xf32, #tpu.memory_space<vmem>>, vector<1x64xf32>
    %18 = vector.extract_strided_slice %17 {offsets = [0, 0], sizes = [1, 32], strides = [1, 1]} : vector<1x64xf32> to vector<1x32xf32>
    %19 = vector.extract_strided_slice %17 {offsets = [0, 32], sizes = [1, 32], strides = [1, 1]} : vector<1x64xf32> to vector<1x32xf32>
    %cst_18 = arith.constant dense<0.000000e+00> : vector<2x192xf32>
    %20 = tpu.matmul %15, %16, %cst_18 {dimension_numbers = #tpu.dot_dimension_numbers<[1], [0], [0], [1], [0, 0, 1, 1], [], []>} : vector<2x64xf32>, vector<64x192xf32>, vector<2x192xf32> -> vector<2x192xf32>
    %21 = vector.extract_strided_slice %10 {offsets = [0, 0], sizes = [2, 96], strides = [1, 1]} : vector<16x96xf32> to vector<2x96xf32>
    %22 = vector.extract_strided_slice %20 {offsets = [0, 0], sizes = [2, 96], strides = [1, 1]} : vector<2x192xf32> to vector<2x96xf32>
    %23 = vector.extract_strided_slice %15 {offsets = [0, 0], sizes = [2, 32], strides = [1, 1]} : vector<2x64xf32> to vector<2x32xf32>
    %24 = vector.extract_strided_slice %21 {offsets = [0, 0], sizes = [2, 32], strides = [1, 1]} : vector<2x96xf32> to vector<2x32xf32>
    %25 = vector.extract_strided_slice %22 {offsets = [0, 0], sizes = [2, 32], strides = [1, 1]} : vector<2x96xf32> to vector<2x32xf32>
    %26 = arith.addf %24, %25 : vector<2x32xf32>
    %27 = arith.negf %26 : vector<2x32xf32>
    %28 = math.exp %27 : vector<2x32xf32>
    %cst_19 = arith.constant 1.000000e+00 : f32
    %29 = vector.broadcast %cst_19 : f32 to vector<2x32xf32>
    %30 = arith.addf %29, %28 : vector<2x32xf32>
    %31 = arith.divf %29, %30 : vector<2x32xf32>
    %32 = vector.extract_strided_slice %21 {offsets = [0, 32], sizes = [2, 32], strides = [1, 1]} : vector<2x96xf32> to vector<2x32xf32>
    %33 = vector.extract_strided_slice %22 {offsets = [0, 32], sizes = [2, 32], strides = [1, 1]} : vector<2x96xf32> to vector<2x32xf32>
    %34 = arith.addf %32, %33 : vector<2x32xf32>
    %35 = arith.negf %34 : vector<2x32xf32>
    %36 = math.exp %35 : vector<2x32xf32>
    %cst_20 = arith.constant 1.000000e+00 : f32
    %37 = vector.broadcast %cst_20 : f32 to vector<2x32xf32>
    %38 = arith.addf %37, %36 : vector<2x32xf32>
    %39 = arith.divf %37, %38 : vector<2x32xf32>
    %40 = vector.extract_strided_slice %21 {offsets = [0, 64], sizes = [2, 32], strides = [1, 1]} : vector<2x96xf32> to vector<2x32xf32>
    %41 = vector.extract_strided_slice %22 {offsets = [0, 64], sizes = [2, 32], strides = [1, 1]} : vector<2x96xf32> to vector<2x32xf32>
    %42 = vector.broadcast %18 : vector<1x32xf32> to vector<2x32xf32>
    %43 = arith.addf %41, %42 : vector<2x32xf32>
    %44 = arith.mulf %31, %43 : vector<2x32xf32>
    %45 = arith.addf %40, %44 : vector<2x32xf32>
    %46 = math.tanh %45 : vector<2x32xf32>
    %cst_21 = arith.constant 1.000000e+00 : f32
    %47 = vector.broadcast %cst_21 : f32 to vector<2x32xf32>
    %48 = arith.subf %47, %39 : vector<2x32xf32>
    %49 = arith.mulf %48, %46 : vector<2x32xf32>
    %50 = arith.mulf %39, %23 : vector<2x32xf32>
    %51 = arith.addf %49, %50 : vector<2x32xf32>
    %52 = vector.extract_strided_slice %11 {offsets = [14, 0], sizes = [2, 96], strides = [1, 1]} : vector<16x96xf32> to vector<2x96xf32>
    %53 = vector.extract_strided_slice %20 {offsets = [0, 96], sizes = [2, 96], strides = [1, 1]} : vector<2x192xf32> to vector<2x96xf32>
    %54 = vector.extract_strided_slice %15 {offsets = [0, 32], sizes = [2, 32], strides = [1, 1]} : vector<2x64xf32> to vector<2x32xf32>
    %55 = vector.extract_strided_slice %52 {offsets = [0, 0], sizes = [2, 32], strides = [1, 1]} : vector<2x96xf32> to vector<2x32xf32>
    %56 = vector.extract_strided_slice %53 {offsets = [0, 0], sizes = [2, 32], strides = [1, 1]} : vector<2x96xf32> to vector<2x32xf32>
    %57 = arith.addf %55, %56 : vector<2x32xf32>
    %58 = arith.negf %57 : vector<2x32xf32>
    %59 = math.exp %58 : vector<2x32xf32>
    %cst_22 = arith.constant 1.000000e+00 : f32
    %60 = vector.broadcast %cst_22 : f32 to vector<2x32xf32>
    %61 = arith.addf %60, %59 : vector<2x32xf32>
    %62 = arith.divf %60, %61 : vector<2x32xf32>
    %63 = vector.extract_strided_slice %52 {offsets = [0, 32], sizes = [2, 32], strides = [1, 1]} : vector<2x96xf32> to vector<2x32xf32>
    %64 = vector.extract_strided_slice %53 {offsets = [0, 32], sizes = [2, 32], strides = [1, 1]} : vector<2x96xf32> to vector<2x32xf32>
    %65 = arith.addf %63, %64 : vector<2x32xf32>
    %66 = arith.negf %65 : vector<2x32xf32>
    %67 = math.exp %66 : vector<2x32xf32>
    %cst_23 = arith.constant 1.000000e+00 : f32
    %68 = vector.broadcast %cst_23 : f32 to vector<2x32xf32>
    %69 = arith.addf %68, %67 : vector<2x32xf32>
    %70 = arith.divf %68, %69 : vector<2x32xf32>
    %71 = vector.extract_strided_slice %52 {offsets = [0, 64], sizes = [2, 32], strides = [1, 1]} : vector<2x96xf32> to vector<2x32xf32>
    %72 = vector.extract_strided_slice %53 {offsets = [0, 64], sizes = [2, 32], strides = [1, 1]} : vector<2x96xf32> to vector<2x32xf32>
    %73 = vector.broadcast %19 : vector<1x32xf32> to vector<2x32xf32>
    %74 = arith.addf %72, %73 : vector<2x32xf32>
    %75 = arith.mulf %62, %74 : vector<2x32xf32>
    %76 = arith.addf %71, %75 : vector<2x32xf32>
    %77 = math.tanh %76 : vector<2x32xf32>
    %cst_24 = arith.constant 1.000000e+00 : f32
    %78 = vector.broadcast %cst_24 : f32 to vector<2x32xf32>
    %79 = arith.subf %78, %70 : vector<2x32xf32>
    %80 = arith.mulf %79, %77 : vector<2x32xf32>
    %81 = arith.mulf %70, %54 : vector<2x32xf32>
    %82 = arith.addf %80, %81 : vector<2x32xf32>
    %c0_i32 = arith.constant 0 : i32
    %83 = vector.broadcast %c0_i32 : i32 to vector<2x1xi32>
    %84 = arith.cmpi sgt, %12, %83 : vector<2x1xi32>
    %85 = vector.extract_strided_slice %15 {offsets = [0, 0], sizes = [2, 32], strides = [1, 1]} : vector<2x64xf32> to vector<2x32xf32>
    %86 = vector.shape_cast %84 : vector<2x1xi1> to vector<2x1xi1>
    %87 = vector.broadcast %86 : vector<2x1xi1> to vector<2x32xi1>
    %88 = arith.select %87, %51, %85 : vector<2x32xi1>, vector<2x32xf32>
    %c7_i32 = arith.constant 7 : i32
    %89 = vector.broadcast %c7_i32 : i32 to vector<2x1xi32>
    %90 = arith.cmpi sgt, %12, %89 : vector<2x1xi32>
    %91 = vector.extract_strided_slice %15 {offsets = [0, 32], sizes = [2, 32], strides = [1, 1]} : vector<2x64xf32> to vector<2x32xf32>
    %92 = vector.shape_cast %90 : vector<2x1xi1> to vector<2x1xi1>
    %93 = vector.broadcast %92 : vector<2x1xi1> to vector<2x32xi1>
    %94 = arith.select %93, %82, %91 : vector<2x32xi1>, vector<2x32xf32>
    %95 = tpu.concatenate %88, %94 in 1 : vector<2x32xf32>, vector<2x32xf32> -> vector<2x64xf32>
    %cst_25 = arith.constant dense<0.000000e+00> : vector<2x192xf32>
    %96 = tpu.matmul %95, %16, %cst_25 {dimension_numbers = #tpu.dot_dimension_numbers<[1], [0], [0], [1], [0, 0, 1, 1], [], []>} : vector<2x64xf32>, vector<64x192xf32>, vector<2x192xf32> -> vector<2x192xf32>
    %97 = vector.extract_strided_slice %10 {offsets = [2, 0], sizes = [2, 96], strides = [1, 1]} : vector<16x96xf32> to vector<2x96xf32>
    %98 = vector.extract_strided_slice %96 {offsets = [0, 0], sizes = [2, 96], strides = [1, 1]} : vector<2x192xf32> to vector<2x96xf32>
    %99 = vector.extract_strided_slice %95 {offsets = [0, 0], sizes = [2, 32], strides = [1, 1]} : vector<2x64xf32> to vector<2x32xf32>
    %100 = vector.extract_strided_slice %97 {offsets = [0, 0], sizes = [2, 32], strides = [1, 1]} : vector<2x96xf32> to vector<2x32xf32>
    %101 = vector.extract_strided_slice %98 {offsets = [0, 0], sizes = [2, 32], strides = [1, 1]} : vector<2x96xf32> to vector<2x32xf32>
    %102 = arith.addf %100, %101 : vector<2x32xf32>
    %103 = arith.negf %102 : vector<2x32xf32>
    %104 = math.exp %103 : vector<2x32xf32>
    %cst_26 = arith.constant 1.000000e+00 : f32
    %105 = vector.broadcast %cst_26 : f32 to vector<2x32xf32>
    %106 = arith.addf %105, %104 : vector<2x32xf32>
    %107 = arith.divf %105, %106 : vector<2x32xf32>
    %108 = vector.extract_strided_slice %97 {offsets = [0, 32], sizes = [2, 32], strides = [1, 1]} : vector<2x96xf32> to vector<2x32xf32>
    %109 = vector.extract_strided_slice %98 {offsets = [0, 32], sizes = [2, 32], strides = [1, 1]} : vector<2x96xf32> to vector<2x32xf32>
    %110 = arith.addf %108, %109 : vector<2x32xf32>
    %111 = arith.negf %110 : vector<2x32xf32>
    %112 = math.exp %111 : vector<2x32xf32>
    %cst_27 = arith.constant 1.000000e+00 : f32
    %113 = vector.broadcast %cst_27 : f32 to vector<2x32xf32>
    %114 = arith.addf %113, %112 : vector<2x32xf32>
    %115 = arith.divf %113, %114 : vector<2x32xf32>
    %116 = vector.extract_strided_slice %97 {offsets = [0, 64], sizes = [2, 32], strides = [1, 1]} : vector<2x96xf32> to vector<2x32xf32>
    %117 = vector.extract_strided_slice %98 {offsets = [0, 64], sizes = [2, 32], strides = [1, 1]} : vector<2x96xf32> to vector<2x32xf32>
    %118 = vector.broadcast %18 : vector<1x32xf32> to vector<2x32xf32>
    %119 = arith.addf %117, %118 : vector<2x32xf32>
    %120 = arith.mulf %107, %119 : vector<2x32xf32>
    %121 = arith.addf %116, %120 : vector<2x32xf32>
    %122 = math.tanh %121 : vector<2x32xf32>
    %cst_28 = arith.constant 1.000000e+00 : f32
    %123 = vector.broadcast %cst_28 : f32 to vector<2x32xf32>
    %124 = arith.subf %123, %115 : vector<2x32xf32>
    %125 = arith.mulf %124, %122 : vector<2x32xf32>
    %126 = arith.mulf %115, %99 : vector<2x32xf32>
    %127 = arith.addf %125, %126 : vector<2x32xf32>
    %128 = vector.extract_strided_slice %11 {offsets = [12, 0], sizes = [2, 96], strides = [1, 1]} : vector<16x96xf32> to vector<2x96xf32>
    %129 = vector.extract_strided_slice %96 {offsets = [0, 96], sizes = [2, 96], strides = [1, 1]} : vector<2x192xf32> to vector<2x96xf32>
    %130 = vector.extract_strided_slice %95 {offsets = [0, 32], sizes = [2, 32], strides = [1, 1]} : vector<2x64xf32> to vector<2x32xf32>
    %131 = vector.extract_strided_slice %128 {offsets = [0, 0], sizes = [2, 32], strides = [1, 1]} : vector<2x96xf32> to vector<2x32xf32>
    %132 = vector.extract_strided_slice %129 {offsets = [0, 0], sizes = [2, 32], strides = [1, 1]} : vector<2x96xf32> to vector<2x32xf32>
    %133 = arith.addf %131, %132 : vector<2x32xf32>
    %134 = arith.negf %133 : vector<2x32xf32>
    %135 = math.exp %134 : vector<2x32xf32>
    %cst_29 = arith.constant 1.000000e+00 : f32
    %136 = vector.broadcast %cst_29 : f32 to vector<2x32xf32>
    %137 = arith.addf %136, %135 : vector<2x32xf32>
    %138 = arith.divf %136, %137 : vector<2x32xf32>
    %139 = vector.extract_strided_slice %128 {offsets = [0, 32], sizes = [2, 32], strides = [1, 1]} : vector<2x96xf32> to vector<2x32xf32>
    %140 = vector.extract_strided_slice %129 {offsets = [0, 32], sizes = [2, 32], strides = [1, 1]} : vector<2x96xf32> to vector<2x32xf32>
    %141 = arith.addf %139, %140 : vector<2x32xf32>
    %142 = arith.negf %141 : vector<2x32xf32>
    %143 = math.exp %142 : vector<2x32xf32>
    %cst_30 = arith.constant 1.000000e+00 : f32
    %144 = vector.broadcast %cst_30 : f32 to vector<2x32xf32>
    %145 = arith.addf %144, %143 : vector<2x32xf32>
    %146 = arith.divf %144, %145 : vector<2x32xf32>
    %147 = vector.extract_strided_slice %128 {offsets = [0, 64], sizes = [2, 32], strides = [1, 1]} : vector<2x96xf32> to vector<2x32xf32>
    %148 = vector.extract_strided_slice %129 {offsets = [0, 64], sizes = [2, 32], strides = [1, 1]} : vector<2x96xf32> to vector<2x32xf32>
    %149 = vector.broadcast %19 : vector<1x32xf32> to vector<2x32xf32>
    %150 = arith.addf %148, %149 : vector<2x32xf32>
    %151 = arith.mulf %138, %150 : vector<2x32xf32>
    %152 = arith.addf %147, %151 : vector<2x32xf32>
    %153 = math.tanh %152 : vector<2x32xf32>
    %cst_31 = arith.constant 1.000000e+00 : f32
    %154 = vector.broadcast %cst_31 : f32 to vector<2x32xf32>
    %155 = arith.subf %154, %146 : vector<2x32xf32>
    %156 = arith.mulf %155, %153 : vector<2x32xf32>
    %157 = arith.mulf %146, %130 : vector<2x32xf32>
    %158 = arith.addf %156, %157 : vector<2x32xf32>
    %c1_i32 = arith.constant 1 : i32
    %159 = vector.broadcast %c1_i32 : i32 to vector<2x1xi32>
    %160 = arith.cmpi sgt, %12, %159 : vector<2x1xi32>
    %161 = vector.extract_strided_slice %95 {offsets = [0, 0], sizes = [2, 32], strides = [1, 1]} : vector<2x64xf32> to vector<2x32xf32>
    %162 = vector.shape_cast %160 : vector<2x1xi1> to vector<2x1xi1>
    %163 = vector.broadcast %162 : vector<2x1xi1> to vector<2x32xi1>
    %164 = arith.select %163, %127, %161 : vector<2x32xi1>, vector<2x32xf32>
    %c6_i32 = arith.constant 6 : i32
    %165 = vector.broadcast %c6_i32 : i32 to vector<2x1xi32>
    %166 = arith.cmpi sgt, %12, %165 : vector<2x1xi32>
    %167 = vector.extract_strided_slice %95 {offsets = [0, 32], sizes = [2, 32], strides = [1, 1]} : vector<2x64xf32> to vector<2x32xf32>
    %168 = vector.shape_cast %166 : vector<2x1xi1> to vector<2x1xi1>
    %169 = vector.broadcast %168 : vector<2x1xi1> to vector<2x32xi1>
    %170 = arith.select %169, %158, %167 : vector<2x32xi1>, vector<2x32xf32>
    %171 = tpu.concatenate %164, %170 in 1 : vector<2x32xf32>, vector<2x32xf32> -> vector<2x64xf32>
    %cst_32 = arith.constant dense<0.000000e+00> : vector<2x192xf32>
    %172 = tpu.matmul %171, %16, %cst_32 {dimension_numbers = #tpu.dot_dimension_numbers<[1], [0], [0], [1], [0, 0, 1, 1], [], []>} : vector<2x64xf32>, vector<64x192xf32>, vector<2x192xf32> -> vector<2x192xf32>
    %173 = vector.extract_strided_slice %10 {offsets = [4, 0], sizes = [2, 96], strides = [1, 1]} : vector<16x96xf32> to vector<2x96xf32>
    %174 = vector.extract_strided_slice %172 {offsets = [0, 0], sizes = [2, 96], strides = [1, 1]} : vector<2x192xf32> to vector<2x96xf32>
    %175 = vector.extract_strided_slice %171 {offsets = [0, 0], sizes = [2, 32], strides = [1, 1]} : vector<2x64xf32> to vector<2x32xf32>
    %176 = vector.extract_strided_slice %173 {offsets = [0, 0], sizes = [2, 32], strides = [1, 1]} : vector<2x96xf32> to vector<2x32xf32>
    %177 = vector.extract_strided_slice %174 {offsets = [0, 0], sizes = [2, 32], strides = [1, 1]} : vector<2x96xf32> to vector<2x32xf32>
    %178 = arith.addf %176, %177 : vector<2x32xf32>
    %179 = arith.negf %178 : vector<2x32xf32>
    %180 = math.exp %179 : vector<2x32xf32>
    %cst_33 = arith.constant 1.000000e+00 : f32
    %181 = vector.broadcast %cst_33 : f32 to vector<2x32xf32>
    %182 = arith.addf %181, %180 : vector<2x32xf32>
    %183 = arith.divf %181, %182 : vector<2x32xf32>
    %184 = vector.extract_strided_slice %173 {offsets = [0, 32], sizes = [2, 32], strides = [1, 1]} : vector<2x96xf32> to vector<2x32xf32>
    %185 = vector.extract_strided_slice %174 {offsets = [0, 32], sizes = [2, 32], strides = [1, 1]} : vector<2x96xf32> to vector<2x32xf32>
    %186 = arith.addf %184, %185 : vector<2x32xf32>
    %187 = arith.negf %186 : vector<2x32xf32>
    %188 = math.exp %187 : vector<2x32xf32>
    %cst_34 = arith.constant 1.000000e+00 : f32
    %189 = vector.broadcast %cst_34 : f32 to vector<2x32xf32>
    %190 = arith.addf %189, %188 : vector<2x32xf32>
    %191 = arith.divf %189, %190 : vector<2x32xf32>
    %192 = vector.extract_strided_slice %173 {offsets = [0, 64], sizes = [2, 32], strides = [1, 1]} : vector<2x96xf32> to vector<2x32xf32>
    %193 = vector.extract_strided_slice %174 {offsets = [0, 64], sizes = [2, 32], strides = [1, 1]} : vector<2x96xf32> to vector<2x32xf32>
    %194 = vector.broadcast %18 : vector<1x32xf32> to vector<2x32xf32>
    %195 = arith.addf %193, %194 : vector<2x32xf32>
    %196 = arith.mulf %183, %195 : vector<2x32xf32>
    %197 = arith.addf %192, %196 : vector<2x32xf32>
    %198 = math.tanh %197 : vector<2x32xf32>
    %cst_35 = arith.constant 1.000000e+00 : f32
    %199 = vector.broadcast %cst_35 : f32 to vector<2x32xf32>
    %200 = arith.subf %199, %191 : vector<2x32xf32>
    %201 = arith.mulf %200, %198 : vector<2x32xf32>
    %202 = arith.mulf %191, %175 : vector<2x32xf32>
    %203 = arith.addf %201, %202 : vector<2x32xf32>
    %204 = vector.extract_strided_slice %11 {offsets = [10, 0], sizes = [2, 96], strides = [1, 1]} : vector<16x96xf32> to vector<2x96xf32>
    %205 = vector.extract_strided_slice %172 {offsets = [0, 96], sizes = [2, 96], strides = [1, 1]} : vector<2x192xf32> to vector<2x96xf32>
    %206 = vector.extract_strided_slice %171 {offsets = [0, 32], sizes = [2, 32], strides = [1, 1]} : vector<2x64xf32> to vector<2x32xf32>
    %207 = vector.extract_strided_slice %204 {offsets = [0, 0], sizes = [2, 32], strides = [1, 1]} : vector<2x96xf32> to vector<2x32xf32>
    %208 = vector.extract_strided_slice %205 {offsets = [0, 0], sizes = [2, 32], strides = [1, 1]} : vector<2x96xf32> to vector<2x32xf32>
    %209 = arith.addf %207, %208 : vector<2x32xf32>
    %210 = arith.negf %209 : vector<2x32xf32>
    %211 = math.exp %210 : vector<2x32xf32>
    %cst_36 = arith.constant 1.000000e+00 : f32
    %212 = vector.broadcast %cst_36 : f32 to vector<2x32xf32>
    %213 = arith.addf %212, %211 : vector<2x32xf32>
    %214 = arith.divf %212, %213 : vector<2x32xf32>
    %215 = vector.extract_strided_slice %204 {offsets = [0, 32], sizes = [2, 32], strides = [1, 1]} : vector<2x96xf32> to vector<2x32xf32>
    %216 = vector.extract_strided_slice %205 {offsets = [0, 32], sizes = [2, 32], strides = [1, 1]} : vector<2x96xf32> to vector<2x32xf32>
    %217 = arith.addf %215, %216 : vector<2x32xf32>
    %218 = arith.negf %217 : vector<2x32xf32>
    %219 = math.exp %218 : vector<2x32xf32>
    %cst_37 = arith.constant 1.000000e+00 : f32
    %220 = vector.broadcast %cst_37 : f32 to vector<2x32xf32>
    %221 = arith.addf %220, %219 : vector<2x32xf32>
    %222 = arith.divf %220, %221 : vector<2x32xf32>
    %223 = vector.extract_strided_slice %204 {offsets = [0, 64], sizes = [2, 32], strides = [1, 1]} : vector<2x96xf32> to vector<2x32xf32>
    %224 = vector.extract_strided_slice %205 {offsets = [0, 64], sizes = [2, 32], strides = [1, 1]} : vector<2x96xf32> to vector<2x32xf32>
    %225 = vector.broadcast %19 : vector<1x32xf32> to vector<2x32xf32>
    %226 = arith.addf %224, %225 : vector<2x32xf32>
    %227 = arith.mulf %214, %226 : vector<2x32xf32>
    %228 = arith.addf %223, %227 : vector<2x32xf32>
    %229 = math.tanh %228 : vector<2x32xf32>
    %cst_38 = arith.constant 1.000000e+00 : f32
    %230 = vector.broadcast %cst_38 : f32 to vector<2x32xf32>
    %231 = arith.subf %230, %222 : vector<2x32xf32>
    %232 = arith.mulf %231, %229 : vector<2x32xf32>
    %233 = arith.mulf %222, %206 : vector<2x32xf32>
    %234 = arith.addf %232, %233 : vector<2x32xf32>
    %c2_i32 = arith.constant 2 : i32
    %235 = vector.broadcast %c2_i32 : i32 to vector<2x1xi32>
    %236 = arith.cmpi sgt, %12, %235 : vector<2x1xi32>
    %237 = vector.extract_strided_slice %171 {offsets = [0, 0], sizes = [2, 32], strides = [1, 1]} : vector<2x64xf32> to vector<2x32xf32>
    %238 = vector.shape_cast %236 : vector<2x1xi1> to vector<2x1xi1>
    %239 = vector.broadcast %238 : vector<2x1xi1> to vector<2x32xi1>
    %240 = arith.select %239, %203, %237 : vector<2x32xi1>, vector<2x32xf32>
    %c5_i32 = arith.constant 5 : i32
    %241 = vector.broadcast %c5_i32 : i32 to vector<2x1xi32>
    %242 = arith.cmpi sgt, %12, %241 : vector<2x1xi32>
    %243 = vector.extract_strided_slice %171 {offsets = [0, 32], sizes = [2, 32], strides = [1, 1]} : vector<2x64xf32> to vector<2x32xf32>
    %244 = vector.shape_cast %242 : vector<2x1xi1> to vector<2x1xi1>
    %245 = vector.broadcast %244 : vector<2x1xi1> to vector<2x32xi1>
    %246 = arith.select %245, %234, %243 : vector<2x32xi1>, vector<2x32xf32>
    %247 = tpu.concatenate %240, %246 in 1 : vector<2x32xf32>, vector<2x32xf32> -> vector<2x64xf32>
    %cst_39 = arith.constant dense<0.000000e+00> : vector<2x192xf32>
    %248 = tpu.matmul %247, %16, %cst_39 {dimension_numbers = #tpu.dot_dimension_numbers<[1], [0], [0], [1], [0, 0, 1, 1], [], []>} : vector<2x64xf32>, vector<64x192xf32>, vector<2x192xf32> -> vector<2x192xf32>
    %249 = vector.extract_strided_slice %10 {offsets = [6, 0], sizes = [2, 96], strides = [1, 1]} : vector<16x96xf32> to vector<2x96xf32>
    %250 = vector.extract_strided_slice %248 {offsets = [0, 0], sizes = [2, 96], strides = [1, 1]} : vector<2x192xf32> to vector<2x96xf32>
    %251 = vector.extract_strided_slice %247 {offsets = [0, 0], sizes = [2, 32], strides = [1, 1]} : vector<2x64xf32> to vector<2x32xf32>
    %252 = vector.extract_strided_slice %249 {offsets = [0, 0], sizes = [2, 32], strides = [1, 1]} : vector<2x96xf32> to vector<2x32xf32>
    %253 = vector.extract_strided_slice %250 {offsets = [0, 0], sizes = [2, 32], strides = [1, 1]} : vector<2x96xf32> to vector<2x32xf32>
    %254 = arith.addf %252, %253 : vector<2x32xf32>
    %255 = arith.negf %254 : vector<2x32xf32>
    %256 = math.exp %255 : vector<2x32xf32>
    %cst_40 = arith.constant 1.000000e+00 : f32
    %257 = vector.broadcast %cst_40 : f32 to vector<2x32xf32>
    %258 = arith.addf %257, %256 : vector<2x32xf32>
    %259 = arith.divf %257, %258 : vector<2x32xf32>
    %260 = vector.extract_strided_slice %249 {offsets = [0, 32], sizes = [2, 32], strides = [1, 1]} : vector<2x96xf32> to vector<2x32xf32>
    %261 = vector.extract_strided_slice %250 {offsets = [0, 32], sizes = [2, 32], strides = [1, 1]} : vector<2x96xf32> to vector<2x32xf32>
    %262 = arith.addf %260, %261 : vector<2x32xf32>
    %263 = arith.negf %262 : vector<2x32xf32>
    %264 = math.exp %263 : vector<2x32xf32>
    %cst_41 = arith.constant 1.000000e+00 : f32
    %265 = vector.broadcast %cst_41 : f32 to vector<2x32xf32>
    %266 = arith.addf %265, %264 : vector<2x32xf32>
    %267 = arith.divf %265, %266 : vector<2x32xf32>
    %268 = vector.extract_strided_slice %249 {offsets = [0, 64], sizes = [2, 32], strides = [1, 1]} : vector<2x96xf32> to vector<2x32xf32>
    %269 = vector.extract_strided_slice %250 {offsets = [0, 64], sizes = [2, 32], strides = [1, 1]} : vector<2x96xf32> to vector<2x32xf32>
    %270 = vector.broadcast %18 : vector<1x32xf32> to vector<2x32xf32>
    %271 = arith.addf %269, %270 : vector<2x32xf32>
    %272 = arith.mulf %259, %271 : vector<2x32xf32>
    %273 = arith.addf %268, %272 : vector<2x32xf32>
    %274 = math.tanh %273 : vector<2x32xf32>
    %cst_42 = arith.constant 1.000000e+00 : f32
    %275 = vector.broadcast %cst_42 : f32 to vector<2x32xf32>
    %276 = arith.subf %275, %267 : vector<2x32xf32>
    %277 = arith.mulf %276, %274 : vector<2x32xf32>
    %278 = arith.mulf %267, %251 : vector<2x32xf32>
    %279 = arith.addf %277, %278 : vector<2x32xf32>
    %280 = vector.extract_strided_slice %11 {offsets = [8, 0], sizes = [2, 96], strides = [1, 1]} : vector<16x96xf32> to vector<2x96xf32>
    %281 = vector.extract_strided_slice %248 {offsets = [0, 96], sizes = [2, 96], strides = [1, 1]} : vector<2x192xf32> to vector<2x96xf32>
    %282 = vector.extract_strided_slice %247 {offsets = [0, 32], sizes = [2, 32], strides = [1, 1]} : vector<2x64xf32> to vector<2x32xf32>
    %283 = vector.extract_strided_slice %280 {offsets = [0, 0], sizes = [2, 32], strides = [1, 1]} : vector<2x96xf32> to vector<2x32xf32>
    %284 = vector.extract_strided_slice %281 {offsets = [0, 0], sizes = [2, 32], strides = [1, 1]} : vector<2x96xf32> to vector<2x32xf32>
    %285 = arith.addf %283, %284 : vector<2x32xf32>
    %286 = arith.negf %285 : vector<2x32xf32>
    %287 = math.exp %286 : vector<2x32xf32>
    %cst_43 = arith.constant 1.000000e+00 : f32
    %288 = vector.broadcast %cst_43 : f32 to vector<2x32xf32>
    %289 = arith.addf %288, %287 : vector<2x32xf32>
    %290 = arith.divf %288, %289 : vector<2x32xf32>
    %291 = vector.extract_strided_slice %280 {offsets = [0, 32], sizes = [2, 32], strides = [1, 1]} : vector<2x96xf32> to vector<2x32xf32>
    %292 = vector.extract_strided_slice %281 {offsets = [0, 32], sizes = [2, 32], strides = [1, 1]} : vector<2x96xf32> to vector<2x32xf32>
    %293 = arith.addf %291, %292 : vector<2x32xf32>
    %294 = arith.negf %293 : vector<2x32xf32>
    %295 = math.exp %294 : vector<2x32xf32>
    %cst_44 = arith.constant 1.000000e+00 : f32
    %296 = vector.broadcast %cst_44 : f32 to vector<2x32xf32>
    %297 = arith.addf %296, %295 : vector<2x32xf32>
    %298 = arith.divf %296, %297 : vector<2x32xf32>
    %299 = vector.extract_strided_slice %280 {offsets = [0, 64], sizes = [2, 32], strides = [1, 1]} : vector<2x96xf32> to vector<2x32xf32>
    %300 = vector.extract_strided_slice %281 {offsets = [0, 64], sizes = [2, 32], strides = [1, 1]} : vector<2x96xf32> to vector<2x32xf32>
    %301 = vector.broadcast %19 : vector<1x32xf32> to vector<2x32xf32>
    %302 = arith.addf %300, %301 : vector<2x32xf32>
    %303 = arith.mulf %290, %302 : vector<2x32xf32>
    %304 = arith.addf %299, %303 : vector<2x32xf32>
    %305 = math.tanh %304 : vector<2x32xf32>
    %cst_45 = arith.constant 1.000000e+00 : f32
    %306 = vector.broadcast %cst_45 : f32 to vector<2x32xf32>
    %307 = arith.subf %306, %298 : vector<2x32xf32>
    %308 = arith.mulf %307, %305 : vector<2x32xf32>
    %309 = arith.mulf %298, %282 : vector<2x32xf32>
    %310 = arith.addf %308, %309 : vector<2x32xf32>
    %c3_i32 = arith.constant 3 : i32
    %311 = vector.broadcast %c3_i32 : i32 to vector<2x1xi32>
    %312 = arith.cmpi sgt, %12, %311 : vector<2x1xi32>
    %313 = vector.extract_strided_slice %247 {offsets = [0, 0], sizes = [2, 32], strides = [1, 1]} : vector<2x64xf32> to vector<2x32xf32>
    %314 = vector.shape_cast %312 : vector<2x1xi1> to vector<2x1xi1>
    %315 = vector.broadcast %314 : vector<2x1xi1> to vector<2x32xi1>
    %316 = arith.select %315, %279, %313 : vector<2x32xi1>, vector<2x32xf32>
    %c4_i32 = arith.constant 4 : i32
    %317 = vector.broadcast %c4_i32 : i32 to vector<2x1xi32>
    %318 = arith.cmpi sgt, %12, %317 : vector<2x1xi32>
    %319 = vector.extract_strided_slice %247 {offsets = [0, 32], sizes = [2, 32], strides = [1, 1]} : vector<2x64xf32> to vector<2x32xf32>
    %320 = vector.shape_cast %318 : vector<2x1xi1> to vector<2x1xi1>
    %321 = vector.broadcast %320 : vector<2x1xi1> to vector<2x32xi1>
    %322 = arith.select %321, %310, %319 : vector<2x32xi1>, vector<2x32xf32>
    %323 = tpu.concatenate %316, %322 in 1 : vector<2x32xf32>, vector<2x32xf32> -> vector<2x64xf32>
    %cst_46 = arith.constant dense<0.000000e+00> : vector<2x192xf32>
    %324 = tpu.matmul %323, %16, %cst_46 {dimension_numbers = #tpu.dot_dimension_numbers<[1], [0], [0], [1], [0, 0, 1, 1], [], []>} : vector<2x64xf32>, vector<64x192xf32>, vector<2x192xf32> -> vector<2x192xf32>
    %325 = vector.extract_strided_slice %10 {offsets = [8, 0], sizes = [2, 96], strides = [1, 1]} : vector<16x96xf32> to vector<2x96xf32>
    %326 = vector.extract_strided_slice %324 {offsets = [0, 0], sizes = [2, 96], strides = [1, 1]} : vector<2x192xf32> to vector<2x96xf32>
    %327 = vector.extract_strided_slice %323 {offsets = [0, 0], sizes = [2, 32], strides = [1, 1]} : vector<2x64xf32> to vector<2x32xf32>
    %328 = vector.extract_strided_slice %325 {offsets = [0, 0], sizes = [2, 32], strides = [1, 1]} : vector<2x96xf32> to vector<2x32xf32>
    %329 = vector.extract_strided_slice %326 {offsets = [0, 0], sizes = [2, 32], strides = [1, 1]} : vector<2x96xf32> to vector<2x32xf32>
    %330 = arith.addf %328, %329 : vector<2x32xf32>
    %331 = arith.negf %330 : vector<2x32xf32>
    %332 = math.exp %331 : vector<2x32xf32>
    %cst_47 = arith.constant 1.000000e+00 : f32
    %333 = vector.broadcast %cst_47 : f32 to vector<2x32xf32>
    %334 = arith.addf %333, %332 : vector<2x32xf32>
    %335 = arith.divf %333, %334 : vector<2x32xf32>
    %336 = vector.extract_strided_slice %325 {offsets = [0, 32], sizes = [2, 32], strides = [1, 1]} : vector<2x96xf32> to vector<2x32xf32>
    %337 = vector.extract_strided_slice %326 {offsets = [0, 32], sizes = [2, 32], strides = [1, 1]} : vector<2x96xf32> to vector<2x32xf32>
    %338 = arith.addf %336, %337 : vector<2x32xf32>
    %339 = arith.negf %338 : vector<2x32xf32>
    %340 = math.exp %339 : vector<2x32xf32>
    %cst_48 = arith.constant 1.000000e+00 : f32
    %341 = vector.broadcast %cst_48 : f32 to vector<2x32xf32>
    %342 = arith.addf %341, %340 : vector<2x32xf32>
    %343 = arith.divf %341, %342 : vector<2x32xf32>
    %344 = vector.extract_strided_slice %325 {offsets = [0, 64], sizes = [2, 32], strides = [1, 1]} : vector<2x96xf32> to vector<2x32xf32>
    %345 = vector.extract_strided_slice %326 {offsets = [0, 64], sizes = [2, 32], strides = [1, 1]} : vector<2x96xf32> to vector<2x32xf32>
    %346 = vector.broadcast %18 : vector<1x32xf32> to vector<2x32xf32>
    %347 = arith.addf %345, %346 : vector<2x32xf32>
    %348 = arith.mulf %335, %347 : vector<2x32xf32>
    %349 = arith.addf %344, %348 : vector<2x32xf32>
    %350 = math.tanh %349 : vector<2x32xf32>
    %cst_49 = arith.constant 1.000000e+00 : f32
    %351 = vector.broadcast %cst_49 : f32 to vector<2x32xf32>
    %352 = arith.subf %351, %343 : vector<2x32xf32>
    %353 = arith.mulf %352, %350 : vector<2x32xf32>
    %354 = arith.mulf %343, %327 : vector<2x32xf32>
    %355 = arith.addf %353, %354 : vector<2x32xf32>
    %356 = vector.extract_strided_slice %11 {offsets = [6, 0], sizes = [2, 96], strides = [1, 1]} : vector<16x96xf32> to vector<2x96xf32>
    %357 = vector.extract_strided_slice %324 {offsets = [0, 96], sizes = [2, 96], strides = [1, 1]} : vector<2x192xf32> to vector<2x96xf32>
    %358 = vector.extract_strided_slice %323 {offsets = [0, 32], sizes = [2, 32], strides = [1, 1]} : vector<2x64xf32> to vector<2x32xf32>
    %359 = vector.extract_strided_slice %356 {offsets = [0, 0], sizes = [2, 32], strides = [1, 1]} : vector<2x96xf32> to vector<2x32xf32>
    %360 = vector.extract_strided_slice %357 {offsets = [0, 0], sizes = [2, 32], strides = [1, 1]} : vector<2x96xf32> to vector<2x32xf32>
    %361 = arith.addf %359, %360 : vector<2x32xf32>
    %362 = arith.negf %361 : vector<2x32xf32>
    %363 = math.exp %362 : vector<2x32xf32>
    %cst_50 = arith.constant 1.000000e+00 : f32
    %364 = vector.broadcast %cst_50 : f32 to vector<2x32xf32>
    %365 = arith.addf %364, %363 : vector<2x32xf32>
    %366 = arith.divf %364, %365 : vector<2x32xf32>
    %367 = vector.extract_strided_slice %356 {offsets = [0, 32], sizes = [2, 32], strides = [1, 1]} : vector<2x96xf32> to vector<2x32xf32>
    %368 = vector.extract_strided_slice %357 {offsets = [0, 32], sizes = [2, 32], strides = [1, 1]} : vector<2x96xf32> to vector<2x32xf32>
    %369 = arith.addf %367, %368 : vector<2x32xf32>
    %370 = arith.negf %369 : vector<2x32xf32>
    %371 = math.exp %370 : vector<2x32xf32>
    %cst_51 = arith.constant 1.000000e+00 : f32
    %372 = vector.broadcast %cst_51 : f32 to vector<2x32xf32>
    %373 = arith.addf %372, %371 : vector<2x32xf32>
    %374 = arith.divf %372, %373 : vector<2x32xf32>
    %375 = vector.extract_strided_slice %356 {offsets = [0, 64], sizes = [2, 32], strides = [1, 1]} : vector<2x96xf32> to vector<2x32xf32>
    %376 = vector.extract_strided_slice %357 {offsets = [0, 64], sizes = [2, 32], strides = [1, 1]} : vector<2x96xf32> to vector<2x32xf32>
    %377 = vector.broadcast %19 : vector<1x32xf32> to vector<2x32xf32>
    %378 = arith.addf %376, %377 : vector<2x32xf32>
    %379 = arith.mulf %366, %378 : vector<2x32xf32>
    %380 = arith.addf %375, %379 : vector<2x32xf32>
    %381 = math.tanh %380 : vector<2x32xf32>
    %cst_52 = arith.constant 1.000000e+00 : f32
    %382 = vector.broadcast %cst_52 : f32 to vector<2x32xf32>
    %383 = arith.subf %382, %374 : vector<2x32xf32>
    %384 = arith.mulf %383, %381 : vector<2x32xf32>
    %385 = arith.mulf %374, %358 : vector<2x32xf32>
    %386 = arith.addf %384, %385 : vector<2x32xf32>
    %c4_i32_53 = arith.constant 4 : i32
    %387 = vector.broadcast %c4_i32_53 : i32 to vector<2x1xi32>
    %388 = arith.cmpi sgt, %12, %387 : vector<2x1xi32>
    %389 = vector.extract_strided_slice %323 {offsets = [0, 0], sizes = [2, 32], strides = [1, 1]} : vector<2x64xf32> to vector<2x32xf32>
    %390 = vector.shape_cast %388 : vector<2x1xi1> to vector<2x1xi1>
    %391 = vector.broadcast %390 : vector<2x1xi1> to vector<2x32xi1>
    %392 = arith.select %391, %355, %389 : vector<2x32xi1>, vector<2x32xf32>
    %c3_i32_54 = arith.constant 3 : i32
    %393 = vector.broadcast %c3_i32_54 : i32 to vector<2x1xi32>
    %394 = arith.cmpi sgt, %12, %393 : vector<2x1xi32>
    %395 = vector.extract_strided_slice %323 {offsets = [0, 32], sizes = [2, 32], strides = [1, 1]} : vector<2x64xf32> to vector<2x32xf32>
    %396 = vector.shape_cast %394 : vector<2x1xi1> to vector<2x1xi1>
    %397 = vector.broadcast %396 : vector<2x1xi1> to vector<2x32xi1>
    %398 = arith.select %397, %386, %395 : vector<2x32xi1>, vector<2x32xf32>
    %399 = tpu.concatenate %392, %398 in 1 : vector<2x32xf32>, vector<2x32xf32> -> vector<2x64xf32>
    %cst_55 = arith.constant dense<0.000000e+00> : vector<2x192xf32>
    %400 = tpu.matmul %399, %16, %cst_55 {dimension_numbers = #tpu.dot_dimension_numbers<[1], [0], [0], [1], [0, 0, 1, 1], [], []>} : vector<2x64xf32>, vector<64x192xf32>, vector<2x192xf32> -> vector<2x192xf32>
    %401 = vector.extract_strided_slice %10 {offsets = [10, 0], sizes = [2, 96], strides = [1, 1]} : vector<16x96xf32> to vector<2x96xf32>
    %402 = vector.extract_strided_slice %400 {offsets = [0, 0], sizes = [2, 96], strides = [1, 1]} : vector<2x192xf32> to vector<2x96xf32>
    %403 = vector.extract_strided_slice %399 {offsets = [0, 0], sizes = [2, 32], strides = [1, 1]} : vector<2x64xf32> to vector<2x32xf32>
    %404 = vector.extract_strided_slice %401 {offsets = [0, 0], sizes = [2, 32], strides = [1, 1]} : vector<2x96xf32> to vector<2x32xf32>
    %405 = vector.extract_strided_slice %402 {offsets = [0, 0], sizes = [2, 32], strides = [1, 1]} : vector<2x96xf32> to vector<2x32xf32>
    %406 = arith.addf %404, %405 : vector<2x32xf32>
    %407 = arith.negf %406 : vector<2x32xf32>
    %408 = math.exp %407 : vector<2x32xf32>
    %cst_56 = arith.constant 1.000000e+00 : f32
    %409 = vector.broadcast %cst_56 : f32 to vector<2x32xf32>
    %410 = arith.addf %409, %408 : vector<2x32xf32>
    %411 = arith.divf %409, %410 : vector<2x32xf32>
    %412 = vector.extract_strided_slice %401 {offsets = [0, 32], sizes = [2, 32], strides = [1, 1]} : vector<2x96xf32> to vector<2x32xf32>
    %413 = vector.extract_strided_slice %402 {offsets = [0, 32], sizes = [2, 32], strides = [1, 1]} : vector<2x96xf32> to vector<2x32xf32>
    %414 = arith.addf %412, %413 : vector<2x32xf32>
    %415 = arith.negf %414 : vector<2x32xf32>
    %416 = math.exp %415 : vector<2x32xf32>
    %cst_57 = arith.constant 1.000000e+00 : f32
    %417 = vector.broadcast %cst_57 : f32 to vector<2x32xf32>
    %418 = arith.addf %417, %416 : vector<2x32xf32>
    %419 = arith.divf %417, %418 : vector<2x32xf32>
    %420 = vector.extract_strided_slice %401 {offsets = [0, 64], sizes = [2, 32], strides = [1, 1]} : vector<2x96xf32> to vector<2x32xf32>
    %421 = vector.extract_strided_slice %402 {offsets = [0, 64], sizes = [2, 32], strides = [1, 1]} : vector<2x96xf32> to vector<2x32xf32>
    %422 = vector.broadcast %18 : vector<1x32xf32> to vector<2x32xf32>
    %423 = arith.addf %421, %422 : vector<2x32xf32>
    %424 = arith.mulf %411, %423 : vector<2x32xf32>
    %425 = arith.addf %420, %424 : vector<2x32xf32>
    %426 = math.tanh %425 : vector<2x32xf32>
    %cst_58 = arith.constant 1.000000e+00 : f32
    %427 = vector.broadcast %cst_58 : f32 to vector<2x32xf32>
    %428 = arith.subf %427, %419 : vector<2x32xf32>
    %429 = arith.mulf %428, %426 : vector<2x32xf32>
    %430 = arith.mulf %419, %403 : vector<2x32xf32>
    %431 = arith.addf %429, %430 : vector<2x32xf32>
    %432 = vector.extract_strided_slice %11 {offsets = [4, 0], sizes = [2, 96], strides = [1, 1]} : vector<16x96xf32> to vector<2x96xf32>
    %433 = vector.extract_strided_slice %400 {offsets = [0, 96], sizes = [2, 96], strides = [1, 1]} : vector<2x192xf32> to vector<2x96xf32>
    %434 = vector.extract_strided_slice %399 {offsets = [0, 32], sizes = [2, 32], strides = [1, 1]} : vector<2x64xf32> to vector<2x32xf32>
    %435 = vector.extract_strided_slice %432 {offsets = [0, 0], sizes = [2, 32], strides = [1, 1]} : vector<2x96xf32> to vector<2x32xf32>
    %436 = vector.extract_strided_slice %433 {offsets = [0, 0], sizes = [2, 32], strides = [1, 1]} : vector<2x96xf32> to vector<2x32xf32>
    %437 = arith.addf %435, %436 : vector<2x32xf32>
    %438 = arith.negf %437 : vector<2x32xf32>
    %439 = math.exp %438 : vector<2x32xf32>
    %cst_59 = arith.constant 1.000000e+00 : f32
    %440 = vector.broadcast %cst_59 : f32 to vector<2x32xf32>
    %441 = arith.addf %440, %439 : vector<2x32xf32>
    %442 = arith.divf %440, %441 : vector<2x32xf32>
    %443 = vector.extract_strided_slice %432 {offsets = [0, 32], sizes = [2, 32], strides = [1, 1]} : vector<2x96xf32> to vector<2x32xf32>
    %444 = vector.extract_strided_slice %433 {offsets = [0, 32], sizes = [2, 32], strides = [1, 1]} : vector<2x96xf32> to vector<2x32xf32>
    %445 = arith.addf %443, %444 : vector<2x32xf32>
    %446 = arith.negf %445 : vector<2x32xf32>
    %447 = math.exp %446 : vector<2x32xf32>
    %cst_60 = arith.constant 1.000000e+00 : f32
    %448 = vector.broadcast %cst_60 : f32 to vector<2x32xf32>
    %449 = arith.addf %448, %447 : vector<2x32xf32>
    %450 = arith.divf %448, %449 : vector<2x32xf32>
    %451 = vector.extract_strided_slice %432 {offsets = [0, 64], sizes = [2, 32], strides = [1, 1]} : vector<2x96xf32> to vector<2x32xf32>
    %452 = vector.extract_strided_slice %433 {offsets = [0, 64], sizes = [2, 32], strides = [1, 1]} : vector<2x96xf32> to vector<2x32xf32>
    %453 = vector.broadcast %19 : vector<1x32xf32> to vector<2x32xf32>
    %454 = arith.addf %452, %453 : vector<2x32xf32>
    %455 = arith.mulf %442, %454 : vector<2x32xf32>
    %456 = arith.addf %451, %455 : vector<2x32xf32>
    %457 = math.tanh %456 : vector<2x32xf32>
    %cst_61 = arith.constant 1.000000e+00 : f32
    %458 = vector.broadcast %cst_61 : f32 to vector<2x32xf32>
    %459 = arith.subf %458, %450 : vector<2x32xf32>
    %460 = arith.mulf %459, %457 : vector<2x32xf32>
    %461 = arith.mulf %450, %434 : vector<2x32xf32>
    %462 = arith.addf %460, %461 : vector<2x32xf32>
    %c5_i32_62 = arith.constant 5 : i32
    %463 = vector.broadcast %c5_i32_62 : i32 to vector<2x1xi32>
    %464 = arith.cmpi sgt, %12, %463 : vector<2x1xi32>
    %465 = vector.extract_strided_slice %399 {offsets = [0, 0], sizes = [2, 32], strides = [1, 1]} : vector<2x64xf32> to vector<2x32xf32>
    %466 = vector.shape_cast %464 : vector<2x1xi1> to vector<2x1xi1>
    %467 = vector.broadcast %466 : vector<2x1xi1> to vector<2x32xi1>
    %468 = arith.select %467, %431, %465 : vector<2x32xi1>, vector<2x32xf32>
    %c2_i32_63 = arith.constant 2 : i32
    %469 = vector.broadcast %c2_i32_63 : i32 to vector<2x1xi32>
    %470 = arith.cmpi sgt, %12, %469 : vector<2x1xi32>
    %471 = vector.extract_strided_slice %399 {offsets = [0, 32], sizes = [2, 32], strides = [1, 1]} : vector<2x64xf32> to vector<2x32xf32>
    %472 = vector.shape_cast %470 : vector<2x1xi1> to vector<2x1xi1>
    %473 = vector.broadcast %472 : vector<2x1xi1> to vector<2x32xi1>
    %474 = arith.select %473, %462, %471 : vector<2x32xi1>, vector<2x32xf32>
    %475 = tpu.concatenate %468, %474 in 1 : vector<2x32xf32>, vector<2x32xf32> -> vector<2x64xf32>
    %cst_64 = arith.constant dense<0.000000e+00> : vector<2x192xf32>
    %476 = tpu.matmul %475, %16, %cst_64 {dimension_numbers = #tpu.dot_dimension_numbers<[1], [0], [0], [1], [0, 0, 1, 1], [], []>} : vector<2x64xf32>, vector<64x192xf32>, vector<2x192xf32> -> vector<2x192xf32>
    %477 = vector.extract_strided_slice %10 {offsets = [12, 0], sizes = [2, 96], strides = [1, 1]} : vector<16x96xf32> to vector<2x96xf32>
    %478 = vector.extract_strided_slice %476 {offsets = [0, 0], sizes = [2, 96], strides = [1, 1]} : vector<2x192xf32> to vector<2x96xf32>
    %479 = vector.extract_strided_slice %475 {offsets = [0, 0], sizes = [2, 32], strides = [1, 1]} : vector<2x64xf32> to vector<2x32xf32>
    %480 = vector.extract_strided_slice %477 {offsets = [0, 0], sizes = [2, 32], strides = [1, 1]} : vector<2x96xf32> to vector<2x32xf32>
    %481 = vector.extract_strided_slice %478 {offsets = [0, 0], sizes = [2, 32], strides = [1, 1]} : vector<2x96xf32> to vector<2x32xf32>
    %482 = arith.addf %480, %481 : vector<2x32xf32>
    %483 = arith.negf %482 : vector<2x32xf32>
    %484 = math.exp %483 : vector<2x32xf32>
    %cst_65 = arith.constant 1.000000e+00 : f32
    %485 = vector.broadcast %cst_65 : f32 to vector<2x32xf32>
    %486 = arith.addf %485, %484 : vector<2x32xf32>
    %487 = arith.divf %485, %486 : vector<2x32xf32>
    %488 = vector.extract_strided_slice %477 {offsets = [0, 32], sizes = [2, 32], strides = [1, 1]} : vector<2x96xf32> to vector<2x32xf32>
    %489 = vector.extract_strided_slice %478 {offsets = [0, 32], sizes = [2, 32], strides = [1, 1]} : vector<2x96xf32> to vector<2x32xf32>
    %490 = arith.addf %488, %489 : vector<2x32xf32>
    %491 = arith.negf %490 : vector<2x32xf32>
    %492 = math.exp %491 : vector<2x32xf32>
    %cst_66 = arith.constant 1.000000e+00 : f32
    %493 = vector.broadcast %cst_66 : f32 to vector<2x32xf32>
    %494 = arith.addf %493, %492 : vector<2x32xf32>
    %495 = arith.divf %493, %494 : vector<2x32xf32>
    %496 = vector.extract_strided_slice %477 {offsets = [0, 64], sizes = [2, 32], strides = [1, 1]} : vector<2x96xf32> to vector<2x32xf32>
    %497 = vector.extract_strided_slice %478 {offsets = [0, 64], sizes = [2, 32], strides = [1, 1]} : vector<2x96xf32> to vector<2x32xf32>
    %498 = vector.broadcast %18 : vector<1x32xf32> to vector<2x32xf32>
    %499 = arith.addf %497, %498 : vector<2x32xf32>
    %500 = arith.mulf %487, %499 : vector<2x32xf32>
    %501 = arith.addf %496, %500 : vector<2x32xf32>
    %502 = math.tanh %501 : vector<2x32xf32>
    %cst_67 = arith.constant 1.000000e+00 : f32
    %503 = vector.broadcast %cst_67 : f32 to vector<2x32xf32>
    %504 = arith.subf %503, %495 : vector<2x32xf32>
    %505 = arith.mulf %504, %502 : vector<2x32xf32>
    %506 = arith.mulf %495, %479 : vector<2x32xf32>
    %507 = arith.addf %505, %506 : vector<2x32xf32>
    %508 = vector.extract_strided_slice %11 {offsets = [2, 0], sizes = [2, 96], strides = [1, 1]} : vector<16x96xf32> to vector<2x96xf32>
    %509 = vector.extract_strided_slice %476 {offsets = [0, 96], sizes = [2, 96], strides = [1, 1]} : vector<2x192xf32> to vector<2x96xf32>
    %510 = vector.extract_strided_slice %475 {offsets = [0, 32], sizes = [2, 32], strides = [1, 1]} : vector<2x64xf32> to vector<2x32xf32>
    %511 = vector.extract_strided_slice %508 {offsets = [0, 0], sizes = [2, 32], strides = [1, 1]} : vector<2x96xf32> to vector<2x32xf32>
    %512 = vector.extract_strided_slice %509 {offsets = [0, 0], sizes = [2, 32], strides = [1, 1]} : vector<2x96xf32> to vector<2x32xf32>
    %513 = arith.addf %511, %512 : vector<2x32xf32>
    %514 = arith.negf %513 : vector<2x32xf32>
    %515 = math.exp %514 : vector<2x32xf32>
    %cst_68 = arith.constant 1.000000e+00 : f32
    %516 = vector.broadcast %cst_68 : f32 to vector<2x32xf32>
    %517 = arith.addf %516, %515 : vector<2x32xf32>
    %518 = arith.divf %516, %517 : vector<2x32xf32>
    %519 = vector.extract_strided_slice %508 {offsets = [0, 32], sizes = [2, 32], strides = [1, 1]} : vector<2x96xf32> to vector<2x32xf32>
    %520 = vector.extract_strided_slice %509 {offsets = [0, 32], sizes = [2, 32], strides = [1, 1]} : vector<2x96xf32> to vector<2x32xf32>
    %521 = arith.addf %519, %520 : vector<2x32xf32>
    %522 = arith.negf %521 : vector<2x32xf32>
    %523 = math.exp %522 : vector<2x32xf32>
    %cst_69 = arith.constant 1.000000e+00 : f32
    %524 = vector.broadcast %cst_69 : f32 to vector<2x32xf32>
    %525 = arith.addf %524, %523 : vector<2x32xf32>
    %526 = arith.divf %524, %525 : vector<2x32xf32>
    %527 = vector.extract_strided_slice %508 {offsets = [0, 64], sizes = [2, 32], strides = [1, 1]} : vector<2x96xf32> to vector<2x32xf32>
    %528 = vector.extract_strided_slice %509 {offsets = [0, 64], sizes = [2, 32], strides = [1, 1]} : vector<2x96xf32> to vector<2x32xf32>
    %529 = vector.broadcast %19 : vector<1x32xf32> to vector<2x32xf32>
    %530 = arith.addf %528, %529 : vector<2x32xf32>
    %531 = arith.mulf %518, %530 : vector<2x32xf32>
    %532 = arith.addf %527, %531 : vector<2x32xf32>
    %533 = math.tanh %532 : vector<2x32xf32>
    %cst_70 = arith.constant 1.000000e+00 : f32
    %534 = vector.broadcast %cst_70 : f32 to vector<2x32xf32>
    %535 = arith.subf %534, %526 : vector<2x32xf32>
    %536 = arith.mulf %535, %533 : vector<2x32xf32>
    %537 = arith.mulf %526, %510 : vector<2x32xf32>
    %538 = arith.addf %536, %537 : vector<2x32xf32>
    %c6_i32_71 = arith.constant 6 : i32
    %539 = vector.broadcast %c6_i32_71 : i32 to vector<2x1xi32>
    %540 = arith.cmpi sgt, %12, %539 : vector<2x1xi32>
    %541 = vector.extract_strided_slice %475 {offsets = [0, 0], sizes = [2, 32], strides = [1, 1]} : vector<2x64xf32> to vector<2x32xf32>
    %542 = vector.shape_cast %540 : vector<2x1xi1> to vector<2x1xi1>
    %543 = vector.broadcast %542 : vector<2x1xi1> to vector<2x32xi1>
    %544 = arith.select %543, %507, %541 : vector<2x32xi1>, vector<2x32xf32>
    %c1_i32_72 = arith.constant 1 : i32
    %545 = vector.broadcast %c1_i32_72 : i32 to vector<2x1xi32>
    %546 = arith.cmpi sgt, %12, %545 : vector<2x1xi32>
    %547 = vector.extract_strided_slice %475 {offsets = [0, 32], sizes = [2, 32], strides = [1, 1]} : vector<2x64xf32> to vector<2x32xf32>
    %548 = vector.shape_cast %546 : vector<2x1xi1> to vector<2x1xi1>
    %549 = vector.broadcast %548 : vector<2x1xi1> to vector<2x32xi1>
    %550 = arith.select %549, %538, %547 : vector<2x32xi1>, vector<2x32xf32>
    %551 = tpu.concatenate %544, %550 in 1 : vector<2x32xf32>, vector<2x32xf32> -> vector<2x64xf32>
    %cst_73 = arith.constant dense<0.000000e+00> : vector<2x192xf32>
    %552 = tpu.matmul %551, %16, %cst_73 {dimension_numbers = #tpu.dot_dimension_numbers<[1], [0], [0], [1], [0, 0, 1, 1], [], []>} : vector<2x64xf32>, vector<64x192xf32>, vector<2x192xf32> -> vector<2x192xf32>
    %553 = vector.extract_strided_slice %10 {offsets = [14, 0], sizes = [2, 96], strides = [1, 1]} : vector<16x96xf32> to vector<2x96xf32>
    %554 = vector.extract_strided_slice %552 {offsets = [0, 0], sizes = [2, 96], strides = [1, 1]} : vector<2x192xf32> to vector<2x96xf32>
    %555 = vector.extract_strided_slice %551 {offsets = [0, 0], sizes = [2, 32], strides = [1, 1]} : vector<2x64xf32> to vector<2x32xf32>
    %556 = vector.extract_strided_slice %553 {offsets = [0, 0], sizes = [2, 32], strides = [1, 1]} : vector<2x96xf32> to vector<2x32xf32>
    %557 = vector.extract_strided_slice %554 {offsets = [0, 0], sizes = [2, 32], strides = [1, 1]} : vector<2x96xf32> to vector<2x32xf32>
    %558 = arith.addf %556, %557 : vector<2x32xf32>
    %559 = arith.negf %558 : vector<2x32xf32>
    %560 = math.exp %559 : vector<2x32xf32>
    %cst_74 = arith.constant 1.000000e+00 : f32
    %561 = vector.broadcast %cst_74 : f32 to vector<2x32xf32>
    %562 = arith.addf %561, %560 : vector<2x32xf32>
    %563 = arith.divf %561, %562 : vector<2x32xf32>
    %564 = vector.extract_strided_slice %553 {offsets = [0, 32], sizes = [2, 32], strides = [1, 1]} : vector<2x96xf32> to vector<2x32xf32>
    %565 = vector.extract_strided_slice %554 {offsets = [0, 32], sizes = [2, 32], strides = [1, 1]} : vector<2x96xf32> to vector<2x32xf32>
    %566 = arith.addf %564, %565 : vector<2x32xf32>
    %567 = arith.negf %566 : vector<2x32xf32>
    %568 = math.exp %567 : vector<2x32xf32>
    %cst_75 = arith.constant 1.000000e+00 : f32
    %569 = vector.broadcast %cst_75 : f32 to vector<2x32xf32>
    %570 = arith.addf %569, %568 : vector<2x32xf32>
    %571 = arith.divf %569, %570 : vector<2x32xf32>
    %572 = vector.extract_strided_slice %553 {offsets = [0, 64], sizes = [2, 32], strides = [1, 1]} : vector<2x96xf32> to vector<2x32xf32>
    %573 = vector.extract_strided_slice %554 {offsets = [0, 64], sizes = [2, 32], strides = [1, 1]} : vector<2x96xf32> to vector<2x32xf32>
    %574 = vector.broadcast %18 : vector<1x32xf32> to vector<2x32xf32>
    %575 = arith.addf %573, %574 : vector<2x32xf32>
    %576 = arith.mulf %563, %575 : vector<2x32xf32>
    %577 = arith.addf %572, %576 : vector<2x32xf32>
    %578 = math.tanh %577 : vector<2x32xf32>
    %cst_76 = arith.constant 1.000000e+00 : f32
    %579 = vector.broadcast %cst_76 : f32 to vector<2x32xf32>
    %580 = arith.subf %579, %571 : vector<2x32xf32>
    %581 = arith.mulf %580, %578 : vector<2x32xf32>
    %582 = arith.mulf %571, %555 : vector<2x32xf32>
    %583 = arith.addf %581, %582 : vector<2x32xf32>
    %584 = vector.extract_strided_slice %11 {offsets = [0, 0], sizes = [2, 96], strides = [1, 1]} : vector<16x96xf32> to vector<2x96xf32>
    %585 = vector.extract_strided_slice %552 {offsets = [0, 96], sizes = [2, 96], strides = [1, 1]} : vector<2x192xf32> to vector<2x96xf32>
    %586 = vector.extract_strided_slice %551 {offsets = [0, 32], sizes = [2, 32], strides = [1, 1]} : vector<2x64xf32> to vector<2x32xf32>
    %587 = vector.extract_strided_slice %584 {offsets = [0, 0], sizes = [2, 32], strides = [1, 1]} : vector<2x96xf32> to vector<2x32xf32>
    %588 = vector.extract_strided_slice %585 {offsets = [0, 0], sizes = [2, 32], strides = [1, 1]} : vector<2x96xf32> to vector<2x32xf32>
    %589 = arith.addf %587, %588 : vector<2x32xf32>
    %590 = arith.negf %589 : vector<2x32xf32>
    %591 = math.exp %590 : vector<2x32xf32>
    %cst_77 = arith.constant 1.000000e+00 : f32
    %592 = vector.broadcast %cst_77 : f32 to vector<2x32xf32>
    %593 = arith.addf %592, %591 : vector<2x32xf32>
    %594 = arith.divf %592, %593 : vector<2x32xf32>
    %595 = vector.extract_strided_slice %584 {offsets = [0, 32], sizes = [2, 32], strides = [1, 1]} : vector<2x96xf32> to vector<2x32xf32>
    %596 = vector.extract_strided_slice %585 {offsets = [0, 32], sizes = [2, 32], strides = [1, 1]} : vector<2x96xf32> to vector<2x32xf32>
    %597 = arith.addf %595, %596 : vector<2x32xf32>
    %598 = arith.negf %597 : vector<2x32xf32>
    %599 = math.exp %598 : vector<2x32xf32>
    %cst_78 = arith.constant 1.000000e+00 : f32
    %600 = vector.broadcast %cst_78 : f32 to vector<2x32xf32>
    %601 = arith.addf %600, %599 : vector<2x32xf32>
    %602 = arith.divf %600, %601 : vector<2x32xf32>
    %603 = vector.extract_strided_slice %584 {offsets = [0, 64], sizes = [2, 32], strides = [1, 1]} : vector<2x96xf32> to vector<2x32xf32>
    %604 = vector.extract_strided_slice %585 {offsets = [0, 64], sizes = [2, 32], strides = [1, 1]} : vector<2x96xf32> to vector<2x32xf32>
    %605 = vector.broadcast %19 : vector<1x32xf32> to vector<2x32xf32>
    %606 = arith.addf %604, %605 : vector<2x32xf32>
    %607 = arith.mulf %594, %606 : vector<2x32xf32>
    %608 = arith.addf %603, %607 : vector<2x32xf32>
    %609 = math.tanh %608 : vector<2x32xf32>
    %cst_79 = arith.constant 1.000000e+00 : f32
    %610 = vector.broadcast %cst_79 : f32 to vector<2x32xf32>
    %611 = arith.subf %610, %602 : vector<2x32xf32>
    %612 = arith.mulf %611, %609 : vector<2x32xf32>
    %613 = arith.mulf %602, %586 : vector<2x32xf32>
    %614 = arith.addf %612, %613 : vector<2x32xf32>
    %c7_i32_80 = arith.constant 7 : i32
    %615 = vector.broadcast %c7_i32_80 : i32 to vector<2x1xi32>
    %616 = arith.cmpi sgt, %12, %615 : vector<2x1xi32>
    %617 = vector.extract_strided_slice %551 {offsets = [0, 0], sizes = [2, 32], strides = [1, 1]} : vector<2x64xf32> to vector<2x32xf32>
    %618 = vector.shape_cast %616 : vector<2x1xi1> to vector<2x1xi1>
    %619 = vector.broadcast %618 : vector<2x1xi1> to vector<2x32xi1>
    %620 = arith.select %619, %583, %617 : vector<2x32xi1>, vector<2x32xf32>
    %c0_i32_81 = arith.constant 0 : i32
    %621 = vector.broadcast %c0_i32_81 : i32 to vector<2x1xi32>
    %622 = arith.cmpi sgt, %12, %621 : vector<2x1xi32>
    %623 = vector.extract_strided_slice %551 {offsets = [0, 32], sizes = [2, 32], strides = [1, 1]} : vector<2x64xf32> to vector<2x32xf32>
    %624 = vector.shape_cast %622 : vector<2x1xi1> to vector<2x1xi1>
    %625 = vector.broadcast %624 : vector<2x1xi1> to vector<2x32xi1>
    %626 = arith.select %625, %614, %623 : vector<2x32xi1>, vector<2x32xf32>
    %627 = tpu.concatenate %620, %626 in 1 : vector<2x32xf32>, vector<2x32xf32> -> vector<2x64xf32>
    %c0_82 = arith.constant 0 : index
    %c0_83 = arith.constant 0 : index
    %628 = vector.load %arg9[%c0_82, %c0_83] : memref<64x32xf32, #tpu.memory_space<vmem>>, vector<64x32xf32>
    %cst_84 = arith.constant dense<0.000000e+00> : vector<2x32xf32>
    %629 = tpu.matmul %627, %628, %cst_84 {dimension_numbers = #tpu.dot_dimension_numbers<[1], [0], [0], [1], [0, 0, 1, 1], [], []>} : vector<2x64xf32>, vector<64x32xf32>, vector<2x32xf32> -> vector<2x32xf32>
    %c0_85 = arith.constant 0 : index
    %c0_86 = arith.constant 0 : index
    %630 = vector.load %arg10[%c0_85, %c0_86] : memref<1x32xf32, #tpu.memory_space<vmem>>, vector<1x32xf32>
    %631 = vector.broadcast %630 : vector<1x32xf32> to vector<2x32xf32>
    %632 = arith.addf %629, %631 : vector<2x32xf32>
    %cst_87 = arith.constant dense<0.000000e+00> : vector<2xf32>
    %633 = vector.multi_reduction <add>, %632, %cst_87 [1] : vector<2x32xf32> to vector<2xf32>
    %634 = vector.shape_cast %633 : vector<2xf32> to vector<2x1xf32>
    %cst_88 = arith.constant 3.200000e+01 : f32
    %635 = vector.broadcast %cst_88 : f32 to vector<2x1xf32>
    %636 = arith.divf %634, %635 : vector<2x1xf32>
    %637 = vector.broadcast %636 : vector<2x1xf32> to vector<2x32xf32>
    %638 = arith.subf %632, %637 : vector<2x32xf32>
    %639 = arith.mulf %638, %638 : vector<2x32xf32>
    %cst_89 = arith.constant dense<0.000000e+00> : vector<2xf32>
    %640 = vector.multi_reduction <add>, %639, %cst_89 [1] : vector<2x32xf32> to vector<2xf32>
    %641 = vector.shape_cast %640 : vector<2xf32> to vector<2x1xf32>
    %cst_90 = arith.constant 3.200000e+01 : f32
    %642 = vector.broadcast %cst_90 : f32 to vector<2x1xf32>
    %643 = arith.divf %641, %642 : vector<2x1xf32>
    %644 = vector.broadcast %636 : vector<2x1xf32> to vector<2x32xf32>
    %645 = arith.subf %632, %644 : vector<2x32xf32>
    %cst_91 = arith.constant 9.99999974E-6 : f32
    %646 = vector.broadcast %cst_91 : f32 to vector<2x1xf32>
    %647 = arith.addf %643, %646 : vector<2x1xf32>
    %648 = math.rsqrt %647 : vector<2x1xf32>
    %649 = vector.broadcast %648 : vector<2x1xf32> to vector<2x32xf32>
    %650 = arith.mulf %645, %649 : vector<2x32xf32>
    %c0_92 = arith.constant 0 : index
    %c0_93 = arith.constant 0 : index
    %651 = vector.load %arg11[%c0_92, %c0_93] : memref<1x32xf32, #tpu.memory_space<vmem>>, vector<1x32xf32>
    %652 = vector.broadcast %651 : vector<1x32xf32> to vector<2x32xf32>
    %653 = arith.mulf %650, %652 : vector<2x32xf32>
    %c0_94 = arith.constant 0 : index
    %c0_95 = arith.constant 0 : index
    %654 = vector.load %arg12[%c0_94, %c0_95] : memref<1x32xf32, #tpu.memory_space<vmem>>, vector<1x32xf32>
    %655 = vector.broadcast %654 : vector<1x32xf32> to vector<2x32xf32>
    %656 = arith.addf %653, %655 : vector<2x32xf32>
    %cst_96 = arith.constant 0.000000e+00 : f32
    %657 = vector.broadcast %cst_96 : f32 to vector<2x32xf32>
    %658 = arith.cmpf oge, %656, %657 : vector<2x32xf32>
    %cst_97 = arith.constant 2.000000e-01 : f32
    %659 = vector.broadcast %cst_97 : f32 to vector<2x32xf32>
    %660 = arith.mulf %659, %656 : vector<2x32xf32>
    %661 = arith.select %658, %656, %660 : vector<2x32xi1>, vector<2x32xf32>
    %c0_98 = arith.constant 0 : index
    %c0_99 = arith.constant 0 : index
    %662 = vector.load %arg13[%c0_98, %c0_99] : memref<32x16xf32, #tpu.memory_space<vmem>>, vector<32x16xf32>
    %cst_100 = arith.constant dense<0.000000e+00> : vector<2x16xf32>
    %663 = tpu.matmul %661, %662, %cst_100 {dimension_numbers = #tpu.dot_dimension_numbers<[1], [0], [0], [1], [0, 0, 1, 1], [], []>} : vector<2x32xf32>, vector<32x16xf32>, vector<2x16xf32> -> vector<2x16xf32>
    %c0_101 = arith.constant 0 : index
    %c0_102 = arith.constant 0 : index
    %664 = vector.load %arg14[%c0_101, %c0_102] : memref<1x16xf32, #tpu.memory_space<vmem>>, vector<1x16xf32>
    %665 = vector.broadcast %664 : vector<1x16xf32> to vector<2x16xf32>
    %666 = arith.addf %663, %665 : vector<2x16xf32>
    %c0_103 = arith.constant 0 : index
    %c0_104 = arith.constant 0 : index
    %667 = vector.load %arg15[%c0_103, %c0_104] : memref<2x16xf32, #tpu.memory_space<vmem>>, vector<2x16xf32>
    tpu.vector_store %arg15[%c0_103, %c0_104], %666 {strides = array<i32>} : memref<2x16xf32, #tpu.memory_space<vmem>>, vector<2x16xf32>,
    return
  }
}

</mosaic_0001>

<bundles_post_ra>
// kernel: tpu_custom_call.1
= control target key start
LH: loop header
LB: loop body
LE: loop exit
PB: predicated region body
PF: predicated region fallthrough
CT: control target
= control target key end

     0   :  { %20 = vsyncpa [#allocation3], 0  ;;  %s3106_s0 = inlined_call_operand.hbm [shape: f32[16,32], index: 0, kind: input, shape index: {}]   ;;  %s3107_s1 = inlined_call_operand.hbm [shape: f32[16,16], index: 1, kind: input, shape index: {}]   ;;  %s3108_s2 = inlined_call_operand.vmem [shape: s32[2,1], index: 2, kind: input, shape index: {}]   ;;  %s3109_s3 = inlined_call_operand.hbm [shape: f32[32,192], index: 3, kind: input, shape index: {}]   ;;  %s3110_s4 = inlined_call_operand.hbm [shape: f32[16,192], index: 4, kind: input, shape index: {}]   ;;  %s3111_s5 = inlined_call_operand.hbm [shape: f32[1,192], index: 5, kind: input, shape index: {}]   ;;  %s3112_s6 = inlined_call_operand.vmem [shape: f32[64,192], index: 6, kind: input, shape index: {}]   ;;  %s3113_s7 = inlined_call_operand.vmem [shape: f32[1,64], index: 7, kind: input, shape index: {}]   ;;  %s3114_s8 = inlined_call_operand.hbm [shape: f32[1,64], index: 8, kind: input, shape index: {}]   ;;  %s3115_s9 = inlined_call_operand.vmem [shape: f32[64,32], index: 9, kind: input, shape index: {}]   ;;  %s3116_s10 = inlined_call_operand.vmem [shape: f32[1,32], index: 10, kind: input, shape index: {}]   ;;  %s3117_s11 = inlined_call_operand.vmem [shape: f32[1,32], index: 11, kind: input, shape index: {}]   ;;  %s3118_s12 = inlined_call_operand.vmem [shape: f32[1,32], index: 12, kind: input, shape index: {}]   ;;  %s3119_s13 = inlined_call_operand.vmem [shape: f32[32,16], index: 13, kind: input, shape index: {}]   ;;  %s3120_s14 = inlined_call_operand.vmem [shape: f32[1,16], index: 14, kind: input, shape index: {}]   ;;  %s3121_s15 = inlined_call_operand.hbm [shape: f32[2,16], index: 15, kind: output, shape index: {}]  }
   0x1   :  { %21 = vsyncpa [#allocation6], 0 }
   0x2   :  { %22 = vsyncpa [#allocation9], 0 }
   0x3   :  { %23 = vsyncpa [#allocation12], 0 }
   0x4   :  { %24 = vsyncpa [#allocation4], 0  ;;  %s2367_s18 = smov [#allocation5]  }
   0x5   :  { %s42_s19 = sshll.u32 %s2367_s18, 4  ;;  %s43_s19 = int_to_ptr.vmem [resolvable:$true] %s42_s19 }
   0x6   :  { %s2225_s20 = scalar_lea.vmem %s43_s19, 256  ;;  %p2230_p1 = scmp.lt.s32.totalorder %s43_s19, %s43_s19 }
   0x7   :  { %p2226_p0 = scmp.ne.s32.totalorder %s43_s19, %s2225_s20  ;;  %p2231_p2 = scmp.lt.s32.totalorder %s2225_s20, %s2225_s20 }
   0x9   :  { %p2232_p3 = por %p2231_p2, %p2230_p1 }
   0xb   :  { %p2233_p4 = pnand %p2232_p3, %p2226_p0 }
   0xd   :  { %2236 = shalt.err (!%p2233_p4)
}
   0xe   :  { %s2368_s21 = smov 128   ;;  %s2369_s22 = smov 8  }
   0xf   :  { %48 = dma.hbm_to_vmem [thread:$0]  %s3107_s1, 256, %s43_s19, [#allocation6], %s2368_s21, %s2368_s21, %s2369_s22  }
  0x10   :  { %s2370_s25 = smov [#allocation8]   ;;  %s2371_s27 = smov [#allocation2]  }
  0x11   :  { %s68_s26 = sshll.u32 %s2370_s25, 4  ;;  %s30_s28 = sshll.u32 %s2371_s27, 4  ;;  %s69_s26 = int_to_ptr.vmem [resolvable:$true] %s68_s26  ;;  %s31_s28 = int_to_ptr.vmem [resolvable:$true] %s30_s28 }
  0x12   :  { %s2245_s29 = scalar_lea.vmem %s69_s26, 512  ;;  %p2250_p6 = scmp.lt.s32.totalorder %s69_s26, %s69_s26 }
  0x13   :  { %p2246_p5 = scmp.ne.s32.totalorder %s69_s26, %s2245_s29  ;;  %p2251_p7 = scmp.lt.s32.totalorder %s2245_s29, %s2245_s29 }
  0x15   :  { %p2252_p8 = por %p2251_p7, %p2250_p6 }
  0x17   :  { %p2253_p9 = pnand %p2252_p8, %p2246_p5 }
  0x19   :  { %2256 = shalt.err (!%p2253_p9)
}
  0x1a   :  { %s2372_s30 = smov 256   ;;  %s2373_s16 = smov 16  }
  0x1b   :  { %74 = dma.hbm_to_vmem [thread:$0]  %s3110_s4, 512, %s69_s26, [#allocation9], %s2372_s30, %s2372_s30, %s2373_s16  }
  0x1c   :  { %s2265_s1 = scalar_lea.vmem %s31_s28, 256  ;;  %p2270_p11 = scmp.lt.s32.totalorder %s31_s28, %s31_s28 }
  0x1d   :  { %p2266_p10 = scmp.ne.s32.totalorder %s31_s28, %s2265_s1  ;;  %p2271_p12 = scmp.lt.s32.totalorder %s2265_s1, %s2265_s1 }
  0x1f   :  { %p2272_p13 = por %p2271_p12, %p2270_p11 }
  0x21   :  { %p2273_p0 = pnand %p2272_p13, %p2266_p10 }
  0x23   :  { %2276 = shalt.err (!%p2273_p0)
}
  0x24   :  { %36 = dma.hbm_to_vmem [thread:$0]  %s3106_s0, 256, %s31_s28, [#allocation3], %s2368_s21, %s2368_s21, %s2369_s22  }
  0x25   :  { %s2374_s23 = smov [#allocation7]   ;;  %s2375_s25 = smov [#allocation10]  }
  0x26   :  { %s56_s24 = sshll.u32 %s2374_s23, 4  ;;  %s81_s27 = sshll.u32 %s2375_s25, 4  ;;  %s57_s24 = int_to_ptr.vmem [resolvable:$true] %s56_s24  ;;  %s82_s27 = int_to_ptr.vmem [resolvable:$true] %s81_s27 }
  0x27   :  { %s2285_s29 = scalar_lea.vmem %s57_s24, 1024  ;;  %p2290_p2 = scmp.lt.s32.totalorder %s57_s24, %s57_s24 }
  0x28   :  { %p2286_p1 = scmp.ne.s32.totalorder %s57_s24, %s2285_s29  ;;  %p2291_p3 = scmp.lt.s32.totalorder %s2285_s29, %s2285_s29 }
  0x2a   :  { %p2292_p4 = por %p2291_p3, %p2290_p2 }
  0x2c   :  { %p2293_p5 = pnand %p2292_p4, %p2286_p1 }
  0x2e   :  { %2296 = shalt.err (!%p2293_p5)
}
  0x2f   :  { %62 = dma.hbm_to_vmem [thread:$0]  %s3109_s3, 1024, %s57_s24, [#allocation6], %s2372_s30, %s2372_s30, %s2373_s16  }
  0x30   :  { %s2305_s17 = scalar_lea.vmem %s82_s27, 32  ;;  %p2310_p7 = scmp.lt.s32.totalorder %s82_s27, %s82_s27 }
  0x31   :  { %p2306_p6 = scmp.ne.s32.totalorder %s82_s27, %s2305_s17  ;;  %p2311_p8 = scmp.lt.s32.totalorder %s2305_s17, %s2305_s17 }
  0x33   :  { %p2312_p9 = por %p2311_p8, %p2310_p7 }
  0x35   :  { %p2313_p10 = pnand %p2312_p9, %p2306_p6 }
  0x37   :  { %2316 = shalt.err (!%p2313_p10)
}
  0x38   :  { %84 = dma.hbm_to_vmem [thread:$0]  %s3111_s5, 32, %s82_s27, [#allocation9]  }
  0x39   :  { %s2376_s22 = smov [#allocation11]  }
  0x3a   :  { %s95_s28 = sshll.u32 %s2376_s22, 4  ;;  %s96_s28 = int_to_ptr.vmem [resolvable:$true] %s95_s28 }
  0x3b   :  { %s2325_s18 = scalar_lea.vmem %s96_s28, 16  ;;  %s2329_s1 = scalar_lea.vmem %s96_s28, 32 }
  0x3c   :  { %p2326_p11 = scmp.ne.s32.totalorder %s96_s28, %s2325_s18  ;;  %p2330_p12 = scmp.lt.s32.totalorder %s96_s28, %s96_s28 }
  0x3d   :  { %p2331_p13 = scmp.lt.s32.totalorder %s2329_s1, %s2325_s18 }
  0x3f   :  { %p2332_p0 = por %p2331_p13, %p2330_p12 }
  0x41   :  { %p2333_p1 = pnand %p2332_p0, %p2326_p11 }
  0x43   :  { %2336 = shalt.err (!%p2333_p1)
}
  0x44   :  { %98 = dma.hbm_to_vmem [thread:$0]  %s3114_s8, 16, %s96_s28, [#allocation12]  }
  0x45   :  { %2357 = dma.done.wait [#allocation3], 256  }
  0x46   :  { %2358 = vsyncadd [#allocation3], 4294967040 }
  0x47   :  { %2359 = dma.done.wait [#allocation6], 1280  }
  0x48   :  { %2360 = vsyncadd [#allocation6], 4294966016 }
  0x49   :  { %2361 = dma.done.wait [#allocation9], 544  }
  0x4a   :  { %2362 = vsyncadd [#allocation9], 4294966752 }
  0x4b   :  { %2363 = dma.done.wait [#allocation12], 16  }
  0x4c   :  { %2364 = vsyncadd [#allocation12], 4294967280  ;;  %v2377_v0 = vmov 0.0   ;;  %v144_v1 = vld [vmem:[#allocation8 + $0x18] sm:$0xff]  ;;  %v143_v3 = vld [vmem:[#allocation8 + $0x10] sm:$0xff]  ;;  %vm145_vm0 = vcmask 130048   ;;  %v315_v35 = vlaneseq }
  0x4d   :  { %216 = vmatprep.mubr.f32.mxu0 %v2377_v0  ;;  %300 = vmatprep.mubr.f32.mxu1 %v2377_v0  ;;  %v138_v2 = vld [vmem:[#allocation7 + $0x38] sm:$0xff]  ;;  %v137_v4 = vld [vmem:[#allocation7 + $0x30] sm:$0xff]  ;;  %v142_v5 = vld [vmem:[#allocation8 + $0x8] sm:$0xff]  ;;  %vm229_vm1 = vcmask 261120   ;;  %s2378_s25 = smov 64   ;;  %vm353_vm2 = vcmask 523264  }
  0x4e   :  { %180 = vmatprep.subr.mxu0 %v144_v1  ;;  %260 = vmatprep.subr.mxu1 %v138_v2  ;;  %v136_v6 = vld [vmem:[#allocation7 + $0x28] sm:$0xff]  ;;  %v141_v7 = vld [vmem:[#allocation8] sm:$0xff]  ;;  %v139_v9 = vld [vmem:[#allocation5] sm:$0xff]  ;;  %v316_v36 = vshrl.u32 %v315_v35, 7  ;;  %s2380_s28 = smov 96   ;;  %s2383_s17 = smov [#allocation13]  }
  0x4f   :  { %181 = vmatpush1.msra.mxu0 %v143_v3  ;;  %261 = vmatpush1.msra.mxu1 %v137_v4  ;;  %v135_v8 = vld [vmem:[#allocation7 + $0x20] sm:$0xff]  ;;  %v134_v10 = vld [vmem:[#allocation7 + $0x18] sm:$0xff]  ;;  %v133_v12 = vld [vmem:[#allocation7 + $0x10] sm:$0xff]  ;;  %s1952_s0 = sshll.u32 %s2383_s17, 4  ;;  %s1953_s0 = int_to_ptr.vmem [resolvable:$true] %s1952_s0 }
  0x50   :  { %182 = vmatprep.subr.mxu0 %v142_v5  ;;  %262 = vmatprep.subr.mxu1 %v136_v6  ;;  %v2487_v11 = vld [vmem:[%s3112_s6 + $0x78] sm:$0xff]  ;;  %v2492_v13 = vld [vmem:[%s3112_s6 + $0x70] sm:$0xff]  ;;  %v132_v14 = vld [vmem:[#allocation7 + $0x8] sm:$0xff]  ;;  %v321_v37 = vsub.s32 1, %v316_v36  ;;  %v317_v58 = vsub.s32 0, %v316_v36  ;;  %p2342_p3 = scmp.lt.s32.totalorder %s1953_s0, %s1953_s0 }
  0x51   :  { %183 = vmatpush1.msra.mxu0 %v141_v7  ;;  %263 = vmatpush1.msra.mxu1 %v135_v8  ;;  %v2498_v15 = vld [vmem:[%s3112_s6 + $0x68] sm:$0xff]  ;;  %v131_v16 = vld [vmem:[#allocation7] sm:$0xff]  ;;  %v2510_v19 = vld [vmem:[%s3112_s6 + $0x58] sm:$0xff] }
  0x52   :  { %1964 = vmatmul.mubr.msk.f32.vlgmr.msra.gmra.mxu0 %vm145_vm0, %v139_v9  ;;  %264 = vmatprep.subr.mxu1 %v134_v10  ;;  %v2504_v17 = vld [vmem:[%s3112_s6 + $0x60] sm:$0xff]  ;;  %v2516_v20 = vld [vmem:[%s3112_s6 + $0x50] sm:$0xff]  ;;  %v2523_v21 = vld [vmem:[%s3112_s6 + $0x48] sm:$0xff]  ;;  %v2379_v10 = vmov 0  }
  0x53   :  { %372 = vmatprep.subr.mxu0 %v2487_v11  ;;  %265 = vmatpush1.msra.mxu1 %v133_v12  ;;  %v129_v18 = vld [vmem:[#allocation2] sm:$0xff]  ;;  %v140_v22 = vld [vmem:[#allocation5 + $0x8] sm:$0xff]  ;;  %v130_v24 = vld [vmem:[#allocation2 + $0x8] sm:$0xff] }
  0x54   :  { %373 = vmatpush1.msra.mxu0 %v2492_v13  ;;  %266 = vmatprep.subr.mxu1 %v132_v14  ;;  %v2529_v23 = vld [vmem:[%s3112_s6 + $0x40] sm:$0xff]  ;;  %v2536_v25 = vld [vmem:[%s3112_s6 + $0x38] sm:$0xff]  ;;  %v2543_v26 = vld [vmem:[%s3112_s6 + $0x30] sm:$0xff] }
  0x55   :  { %374 = vmatprep.subr.mxu0 %v2498_v15  ;;  %267 = vmatpush1.msra.mxu1 %v131_v16  ;;  %v2549_v27 = vld [vmem:[%s3113_s7] ss:$0 sm:$0xff]  ;;  %v2556_v28 = vld [vmem:[%s3112_s6 + $0x28] sm:$0xff]  ;;  %v2569_v30 = vld [vmem:[%s3112_s6 + $0x18] sm:$0xff] }
  0x56   :  { %375 = vmatpush1.msra.mxu0 %v2504_v17  ;;  %1966 = vmatmul.mubr.msk.f32.vlgmr.msra.gmra.mxu1 %vm229_vm1, %v129_v18  ;;  %v2562_v29 = vld [vmem:[%s3112_s6 + $0x20] sm:$0xff]  ;;  %v2577_v31 = vld [vmem:[%s3112_s6 + $0x10] sm:$0xff]  ;;  %v2584_v32 = vld [vmem:[%s3112_s6 + $0x8] sm:$0xff] }
  0x57   :  { %376 = vmatprep.subr.mxu0 %v2510_v19  ;;  %222 = vmatprep.mubr.f32.mxu0 %v2377_v0  ;;  %v2591_v33 = vld [vmem:[%s3112_s6] sm:$0xff] }
  0x58   :  { %377 = vmatpush1.msra.mxu0 %v2516_v20  ;;  %306 = vmatprep.mubr.f32.mxu1 %v2377_v0  ;;  %v2595_v34 = vld [vmem:[#allocation11] ss:$0 sm:$0xff]  ;;  %v313_v38 = vld [vmem:[#allocation10] sm:$0x3] }
  0x59   :  { %378 = vmatprep.subr.mxu0 %v2523_v21  ;;  %1965 = vmatmul.mubr.msk.f32.gmra.mxu0 %vm145_vm0, %v140_v22  ;;  %v322_v39 = vrot.slane %v313_v38, %v321_v37  ;;  %v318_v60 = vrot.slane %v313_v38, %v317_v58  ;;  %v2655_v18 = vld [vmem:[%s3108_s2] sm:$0x3]  ;;  %s2381_s2 = smov 32  }
  0x5a   :  { %379 = vmatpush1.msra.mxu0 %v2529_v23  ;;  %1967 = vmatmul.mubr.msk.f32.gmra.mxu1 %vm229_vm1, %v130_v24  ;;  %vm510_vm3 = vcmp.gt.s32.totalorder %v2655_v18, 0  ;;  %vm517_vm4 = vcmp.gt.s32.totalorder %v2655_v18, 7  ;;  %vm701_vm7 = vcmp.gt.s32.totalorder %v2655_v18, 6  ;;  %vm689_vm8 = vcmp.gt.s32.totalorder %v2655_v18, 1 }
  0x5b   :  { %380 = vmatprep.subr.mxu0 %v2536_v25  ;;  %420 = vmatprep.mubr.f32.mxu0 %v2377_v0  ;;  %v511_v36 = vsel %vm510_vm3, 1, %v2379_v10  ;;  %v518_v37 = vsel %vm517_vm4, 1, %v2379_v10  ;;  %vm884_vm11 = vcmp.gt.s32.totalorder %v2655_v18, 5  ;;  %vm872_vm12 = vcmp.gt.s32.totalorder %v2655_v18, 2 }
  0x5c   :  { %381 = vmatpush1.msra.mxu0 %v2543_v26  ;;  %439 = vrot.lane.b32.xlu0 %v2549_v27, %s2378_s25  ;;  %vm1060_vm15 = vcmp.gt.s32.totalorder %v2655_v18, 4  ;;  %vm1048_vm0 = vcmp.gt.s32.totalorder %v2655_v18, 3 }
  0x5d   :  { %382 = vmatprep.subr.mxu0 %v2556_v28  ;;  %555 = vmatprep.subr.mxu1 %v2487_v11 }
  0x5e   :  { %383 = vmatpush1.msra.mxu0 %v2562_v29  ;;  %556 = vmatpush1.msra.mxu1 %v2492_v13 }
  0x5f   :  { %384 = vmatprep.subr.mxu0 %v2569_v30  ;;  %557 = vmatprep.subr.mxu1 %v2498_v15 }
  0x60   :  { %385 = vmatpush1.msra.mxu0 %v2577_v31  ;;  %558 = vmatpush1.msra.mxu1 %v2504_v17 }
  0x61   :  { %386 = vmatprep.subr.mxu0 %v2584_v32  ;;  %559 = vmatprep.subr.mxu1 %v2510_v19 }
  0x62   :  { %387 = vmatpush1.msra.mxu0 %v2591_v33  ;;  %560 = vmatpush1.msra.mxu1 %v2516_v20 }
  0x63   :  { %1969 = vmatmul.mubr.msk.f32.vlgmr.msra.gmra.mxu0 %vm353_vm2, %v2595_v34  ;;  %561 = vmatprep.subr.mxu1 %v2523_v21 }
  0x64   :  { %562 = vmatpush1.msra.mxu1 %v2529_v23  ;;  %603 = vmatprep.mubr.f32.mxu1 %v2377_v0 }
  0x65   :  { %563 = vmatprep.subr.mxu1 %v2536_v25  ;;  %738 = vmatprep.subr.mxu0 %v2487_v11 }
  0x66   :  { %564 = vmatpush1.msra.mxu1 %v2543_v26  ;;  %739 = vmatpush1.msra.mxu0 %v2492_v13 }
  0x67   :  { %565 = vmatprep.subr.mxu1 %v2556_v28  ;;  %740 = vmatprep.subr.mxu0 %v2498_v15 }
  0x68   :  { %566 = vmatpush1.msra.mxu1 %v2562_v29  ;;  %741 = vmatpush1.msra.mxu0 %v2504_v17 }
  0x69   :  { %567 = vmatprep.subr.mxu1 %v2569_v30  ;;  %742 = vmatprep.subr.mxu0 %v2510_v19 }
  0x6a   :  { %568 = vmatpush1.msra.mxu1 %v2577_v31  ;;  %743 = vmatpush1.msra.mxu0 %v2516_v20 }
  0x6b   :  { %569 = vmatprep.subr.mxu1 %v2584_v32  ;;  %744 = vmatprep.subr.mxu0 %v2523_v21 }
  0x6c   :  { %570 = vmatpush1.msra.mxu1 %v2591_v33  ;;  %745 = vmatpush1.msra.mxu0 %v2529_v23 }
  0x6d   :  { %746 = vmatprep.subr.mxu0 %v2536_v25  ;;  %786 = vmatprep.mubr.f32.mxu0 %v2377_v0 }
  0x6e   :  { %747 = vmatpush1.msra.mxu0 %v2543_v26  ;;  %921 = vmatprep.subr.mxu1 %v2487_v11 }
  0x6f   :  { %748 = vmatprep.subr.mxu0 %v2556_v28  ;;  %2069 = vset.pattern.permute.xlu1 %v2379_v10 }
  0x70   :  { %749 = vmatpush1.msra.mxu0 %v2562_v29  ;;  %2070 = vset.pattern.permute.xlu0 %v2379_v10 }
  0x71   :  { %750 = vmatprep.subr.mxu0 %v2569_v30 }
  0x72   :  { %751 = vmatpush1.msra.mxu0 %v2577_v31 }
  0x73   :  { %752 = vmatprep.subr.mxu0 %v2584_v32 }
  0x74   :  { %753 = vmatpush1.msra.mxu0 %v2591_v33 }
  0x75   :  { %1091 = vmatprep.subr.mxu0 %v2487_v11 }
  0xce   :  { %v2638_v52 = vpop.permute.xlu0 %439 }
 0x112   :  { %v218_v40 = vpop.f32.mrf.mxu0 }
 0x114   :  { %v220_v42 = vpop.f32.mrf.mxu0 }
 0x116   :  { %v302_v41 = vpop.f32.mrf.mxu1 }
 0x117   :  { %v303_v59 = vadd.f32 %v302_v41, %v218_v40 }
 0x118   :  { %v304_v43 = vpop.f32.mrf.mxu1 }
 0x119   :  { %v305_v44 = vadd.f32 %v304_v43, %v220_v42  ;;  %v224_v45 = vpop.f32.mrf.mxu0  ;;  %v2644_v61 = vadd.f32 %v318_v60, %v303_v59 }
 0x11a   :  { %v308_v46 = vpop.f32.mrf.mxu1 }
 0x11b   :  { %v2634_v47 = vadd.f32 %v322_v39, %v305_v44  ;;  %v226_v48 = vpop.f32.mrf.mxu0  ;;  %v309_v62 = vadd.f32 %v308_v46, %v224_v45 }
 0x11c   :  { %v310_v49 = vpop.f32.mrf.mxu1 }
 0x11d   :  { %v311_v50 = vadd.f32 %v310_v49, %v226_v48  ;;  %v2647_v2 = vadd.f32 %v318_v60, %v309_v62 }
 0x11f   :  { %v2636_v51 = vadd.f32 %v322_v39, %v311_v50 }
 0x123   :  { %v422_v53 = vpop.f32.mrf.mxu0 }
 0x124   :  { %v442_v54 = vadd.f32 %v2638_v52, %v422_v53  ;;  %v427_v63 = vadd.f32 %v422_v53, %v2644_v61  ;;  %v466_v1 = vrot.slane %v422_v53, 2 }
 0x125   :  { %v424_v55 = vpop.f32.mrf.mxu0 }
 0x126   :  { %v486_v56 = vadd.f32 %v2549_v27, %v424_v55  ;;  %444 = vrot.lane.b32.xlu1 %v442_v54, %s2378_s25  ;;  %v1970_v3 = vmul.f32 -1.442695, %v427_v63  ;;  %v468_v4 = vadd.f32 %v466_v1, %v2647_v2  ;;  %v476_v44 = vrot.slane %v424_v55, 2 }
 0x128   :  { %v488_v57 = vrot.slane %v486_v56, 2  ;;  %2071 = vpow2.f32 %v1970_v3  ;;  %v1972_v5 = vmul.f32 -1.442695, %v468_v4  ;;  %v478_v45 = vadd.f32 %v476_v44, %v2636_v51 }
 0x12a   :  { %489 = vrot.lane.b32.xlu0 %v488_v57, %s2378_s25  ;;  %2073 = vpow2.f32 %v1972_v5  ;;  %v1973_v46 = vmul.f32 -1.442695, %v478_v45 }
 0x135   :  { %v2072_v6 = vpop.eup %2071 }
 0x136   :  { %v431_v7 = vadd.f32 1.0, %v2072_v6 }
 0x137   :  { %v2074_v8 = vpop.eup %2073 }
 0x138   :  { %2075 = vrcp.f32 %v431_v7  ;;  %v472_v9 = vadd.f32 1.0, %v2074_v8 }
 0x13a   :  { %2077 = vrcp.f32 %v472_v9 }
 0x145   :  { %v2076_v12 = vpop.eup %2075 }
 0x147   :  { %v2078_v22 = vpop.eup %2077 }
 0x198   :  { %v445_v14 = vpop.permute.xlu1 %444 }
 0x199   :  { %v447_v16 = vmul.f32 %v2076_v12, %v445_v14 }
 0x19b   :  { %449 = vrot.lane.b32.xlu0 %v447_v16, %s2378_s25 }
 0x19c   :  { %v490_v24 = vpop.permute.xlu0 %489 }
 0x19d   :  { %v492_v35 = vmul.f32 %v2078_v22, %v490_v24 }
 0x19f   :  { %494 = vrot.lane.b32.xlu1 %v492_v35, %s2378_s25  ;;  %505 = vrot.lane.b32.xlu0 %v2595_v34, %s2380_s28 }
 0x1a3   :  { %513 = vperm.xlu1 %2069, %v511_v36   ;;  %520 = vperm.xlu0 %2070, %v518_v37  }
 0x20d   :  { %v450_v38 = vpop.permute.xlu0 %449 }
 0x20e   :  { %v452_v39 = vadd.f32 %v450_v38, %v2644_v61 }
 0x210   :  { %2079 = vtanh.f32 %v452_v39 }
 0x211   :  { %v495_v40 = vpop.permute.xlu1 %494  ;;  %v506_v56 = vpop.permute.xlu0 %505 }
 0x212   :  { %v497_v41 = vadd.f32 %v495_v40, %v2636_v51 }
 0x214   :  { %2081 = vtanh.f32 %v497_v41 }
 0x215   :  { %2083 = vpow2.f32 %v1973_v46 }
 0x21d   :  { %v2080_v42 = vpop.eup %2079 }
 0x21e   :  { %456 = vrot.lane.b32.xlu1 %v2080_v42, %s2380_s28  ;;  %v2672_v50 = vpop.permute.xlu1 %513  ;;  %v2674_v62 = vpop.permute.xlu0 %520 }
 0x21f   :  { %vm522_vm5 = vcmp.eq.s32.totalorder %v2674_v62, 1  ;;  %vm515_vm6 = vcmp.eq.s32.totalorder %v2672_v50, 1 }
 0x221   :  { %v2082_v43 = vpop.eup %2081 }
 0x222   :  { %501 = vrot.lane.b32.xlu1 %v2082_v43, %s2380_s28  ;;  %v2084_v48 = vpop.eup %2083 }
 0x223   :  { %v482_v49 = vadd.f32 1.0, %v2084_v48 }
 0x225   :  { %2085 = vrcp.f32 %v482_v49 }
 0x226   :  { %460 = vrot.lane.b32.xlu1 %v2595_v34, %s2381_s2  ;;  %v454_v34 = vsub.f32 1.0, %v2076_v12 }
 0x232   :  { %v2086_v53 = vpop.eup %2085 }
 0x233   :  { %v499_v57 = vsub.f32 1.0, %v2086_v53  ;;  %v508_v59 = vmul.f32 %v2086_v53, %v506_v56 }
 0x290   :  { %v457_v54 = vpop.permute.xlu1 %456 }
 0x291   :  { %v459_v1 = vmul.f32 %v457_v54, %v454_v34 }
 0x294   :  { %v502_v58 = vpop.permute.xlu1 %501 }
 0x295   :  { %v504_v60 = vmul.f32 %v502_v58, %v499_v57 }
 0x297   :  { %v509_v55 = vadd.f32 %v508_v59, %v504_v60 }
 0x298   :  { %v461_v63 = vpop.permute.xlu1 %460 }
 0x299   :  { %v524_v3 = vrot.slane %v509_v55, 6  ;;  %v463_v4 = vmul.f32 %v2076_v12, %v461_v63 }
 0x29b   :  { %v464_v5 = vadd.f32 %v463_v4, %v459_v1  ;;  %v526_v6 = vsel %vm522_vm5, %v524_v3, %v506_v56  ;;  %v702_v4 = vsel %vm701_vm7, 1, %v2379_v10  ;;  %vm2382_vm7 = vmmov 0  }
 0x29c   :  { %532 = vrot.lane.b32.xlu1 %v526_v6, %s2381_s2 }
 0x29d   :  { %v516_v7 = vsel %vm515_vm6, %v464_v5, %v461_v63  ;;  %v690_v5 = vsel %vm689_vm8, 1, %v2379_v10  ;;  %vm1826_vm8 = vcmask 254976  }
 0x29e   :  { %528 = vrot.lane.b32.xlu0 %v516_v7, %s2380_s28 }
 0x30e   :  { %v533_v8 = vpop.permute.xlu1 %532 }
 0x310   :  { %v529_v9 = vpop.permute.xlu0 %528 }
 0x311   :  { %v2685_v14 = vsel %vm229_vm1, %v529_v9, %v533_v8 }
 0x312   :  { %1974 = vmatmul.mubr.msk.f32.vlgmr.msra.gmra.mxu1 %vm353_vm2, %v2685_v14  ;;  %v639_v58 = vrot.slane %v2685_v14, 6  ;;  %v683_v59 = vrot.slane %v2685_v14, 4 }
 0x313   :  { %922 = vmatpush1.msra.mxu1 %v2492_v13  ;;  %969 = vmatprep.mubr.f32.mxu1 %v2377_v0 }
 0x314   :  { %923 = vmatprep.subr.mxu1 %v2498_v15 }
 0x315   :  { %924 = vmatpush1.msra.mxu1 %v2504_v17 }
 0x316   :  { %925 = vmatprep.subr.mxu1 %v2510_v19 }
 0x317   :  { %926 = vmatpush1.msra.mxu1 %v2516_v20 }
 0x318   :  { %927 = vmatprep.subr.mxu1 %v2523_v21 }
 0x319   :  { %928 = vmatpush1.msra.mxu1 %v2529_v23 }
 0x31a   :  { %929 = vmatprep.subr.mxu1 %v2536_v25 }
 0x31b   :  { %930 = vmatpush1.msra.mxu1 %v2543_v26 }
 0x31c   :  { %931 = vmatprep.subr.mxu1 %v2556_v28 }
 0x31d   :  { %932 = vmatpush1.msra.mxu1 %v2562_v29 }
 0x31e   :  { %933 = vmatprep.subr.mxu1 %v2569_v30 }
 0x31f   :  { %934 = vmatpush1.msra.mxu1 %v2577_v31 }
 0x320   :  { %935 = vmatprep.subr.mxu1 %v2584_v32 }
 0x321   :  { %936 = vmatpush1.msra.mxu1 %v2591_v33 }
 0x322   :  { %1257 = vmatprep.subr.mxu1 %v2487_v11 }
 0x3d2   :  { %v605_v12 = vpop.f32.mrf.mxu1 }
 0x3d3   :  { %v620_v16 = vadd.f32 %v605_v12, %v2638_v52  ;;  %v611_v37 = vrot.slane %v605_v12, 6  ;;  %v645_v38 = vrot.slane %v605_v12, 4 }
 0x3d4   :  { %v607_v22 = vpop.f32.mrf.mxu1 }
 0x3d5   :  { %v664_v24 = vadd.f32 %v2549_v27, %v607_v22  ;;  %v622_v35 = vrot.slane %v620_v16, 6  ;;  %v613_v39 = vadd.f32 %v611_v37, %v2644_v61  ;;  %v647_v40 = vadd.f32 %v645_v38, %v2647_v2 }
 0x3d6   :  { %v655_v6 = vrot.slane %v607_v22, 4 }
 0x3d7   :  { %v666_v36 = vrot.slane %v664_v24, 4  ;;  %623 = vrot.lane.b32.xlu0 %v622_v35, %s2378_s25  ;;  %v1975_v41 = vmul.f32 -1.442695, %v613_v39  ;;  %v1976_v42 = vmul.f32 -1.442695, %v647_v40 }
 0x3d8   :  { %v657_v7 = vadd.f32 %v655_v6, %v2636_v51 }
 0x3d9   :  { %667 = vrot.lane.b32.xlu1 %v666_v36, %s2378_s25  ;;  %2087 = vpow2.f32 %v1975_v41 }
 0x3da   :  { %2089 = vpow2.f32 %v1976_v42  ;;  %v1977_v8 = vmul.f32 -1.442695, %v657_v7 }
 0x3e6   :  { %v2088_v43 = vpop.eup %2087 }
 0x3e7   :  { %v2090_v44 = vpop.eup %2089  ;;  %v617_v45 = vadd.f32 1.0, %v2088_v43 }
 0x3e8   :  { %v651_v46 = vadd.f32 1.0, %v2090_v44 }
 0x3e9   :  { %2091 = vrcp.f32 %v617_v45 }
 0x3ea   :  { %2093 = vrcp.f32 %v651_v46 }
 0x3f6   :  { %v2092_v48 = vpop.eup %2091 }
 0x3f7   :  { %v2094_v53 = vpop.eup %2093  ;;  %v633_v24 = vsub.f32 1.0, %v2092_v48 }
 0x449   :  { %v624_v49 = vpop.permute.xlu0 %623 }
 0x44a   :  { %v626_v54 = vmul.f32 %v2092_v48, %v624_v49 }
 0x44b   :  { %v668_v56 = vpop.permute.xlu1 %667 }
 0x44c   :  { %v670_v57 = vmul.f32 %v2094_v53, %v668_v56  ;;  %628 = vrot.lane.b32.xlu0 %v626_v54, %s2378_s25 }
 0x44e   :  { %672 = vrot.lane.b32.xlu1 %v670_v57, %s2378_s25 }
 0x452   :  { %640 = vrot.lane.b32.xlu1 %v639_v58, %s2381_s2 }
 0x456   :  { %684 = vrot.lane.b32.xlu1 %v683_v59, %s2380_s28 }
 0x45a   :  { %710 = vrot.lane.b32.xlu1 %v2685_v14, %s2380_s28 }
 0x4be   :  { %v629_v60 = vpop.permute.xlu0 %628 }
 0x4bf   :  { %v631_v34 = vadd.f32 %v629_v60, %v2644_v61 }
 0x4c0   :  { %v673_v55 = vpop.permute.xlu1 %672 }
 0x4c1   :  { %2095 = vtanh.f32 %v631_v34  ;;  %v675_v63 = vadd.f32 %v673_v55, %v2636_v51 }
 0x4c3   :  { %2097 = vtanh.f32 %v675_v63 }
 0x4c4   :  { %2099 = vpow2.f32 %v1977_v8  ;;  %v641_v16 = vpop.permute.xlu1 %640 }
 0x4c5   :  { %v643_v36 = vmul.f32 %v2092_v48, %v641_v16 }
 0x4c8   :  { %v685_v22 = vpop.permute.xlu1 %684 }
 0x4cc   :  { %v711_v53 = vpop.permute.xlu1 %710 }
 0x4ce   :  { %v2096_v1 = vpop.eup %2095 }
 0x4cf   :  { %635 = vrot.lane.b32.xlu0 %v2096_v1, %s2380_s28 }
 0x4d0   :  { %v2098_v3 = vpop.eup %2097 }
 0x4d1   :  { %v2100_v9 = vpop.eup %2099 }
 0x4d2   :  { %v661_v12 = vadd.f32 1.0, %v2100_v9 }
 0x4d3   :  { %679 = vrot.lane.b32.xlu0 %v2098_v3, %s2380_s28 }
 0x4d4   :  { %2101 = vrcp.f32 %v661_v12 }
 0x4d7   :  { %704 = vperm.xlu0 %2070, %v702_v4  }
 0x4db   :  { %692 = vperm.xlu0 %2070, %v690_v5  }
 0x4e1   :  { %v2102_v39 = vpop.eup %2101 }
 0x4e2   :  { %v677_v42 = vsub.f32 1.0, %v2102_v39  ;;  %v687_v44 = vmul.f32 %v2102_v39, %v685_v22 }
 0x541   :  { %v636_v35 = vpop.permute.xlu0 %635 }
 0x542   :  { %v638_v37 = vmul.f32 %v636_v35, %v633_v24 }
 0x544   :  { %v644_v38 = vadd.f32 %v643_v36, %v638_v37 }
 0x545   :  { %v680_v41 = vpop.permute.xlu0 %679 }
 0x546   :  { %v696_v40 = vrot.slane %v644_v38, 2  ;;  %v682_v43 = vmul.f32 %v680_v41, %v677_v42 }
 0x548   :  { %697 = vrot.lane.b32.xlu1 %v696_v40, %s2380_s28  ;;  %v688_v45 = vadd.f32 %v687_v44, %v682_v43 }
 0x54a   :  { %v708_v46 = vrot.slane %v688_v45, 4 }
 0x552   :  { %v2730_v49 = vpop.permute.xlu0 %704 }
 0x553   :  { %vm706_vm9 = vcmp.eq.s32.totalorder %v2730_v49, 1 }
 0x554   :  { %v713_v48 = vsel %vm706_vm9, %v708_v46, %v711_v53 }
 0x555   :  { %715 = vrot.lane.b32.xlu0 %v713_v48, %s2381_s2  ;;  %v885_v48 = vsel %vm884_vm11, 1, %v2379_v10 }
 0x556   :  { %v2736_v54 = vpop.permute.xlu0 %692 }
 0x557   :  { %vm694_vm10 = vcmp.eq.s32.totalorder %v2736_v54, 1 }
 0x5ba   :  { %v698_v56 = vpop.permute.xlu1 %697 }
 0x5bb   :  { %v700_v57 = vsel %vm694_vm10, %v698_v56, %v2685_v14  ;;  %v873_v56 = vsel %vm872_vm12, 1, %v2379_v10 }
 0x5c7   :  { %v716_v58 = vpop.permute.xlu0 %715 }
 0x5c8   :  { %v2743_v59 = vsel %vm229_vm1, %v700_v57, %v716_v58 }
 0x5c9   :  { %1978 = vmatmul.mubr.msk.f32.vlgmr.msra.gmra.mxu0 %vm353_vm2, %v2743_v59  ;;  %v822_v41 = vrot.slane %v2743_v59, 4  ;;  %v866_v42 = vrot.slane %v2743_v59, 6 }
 0x5ca   :  { %1092 = vmatpush1.msra.mxu0 %v2492_v13  ;;  %1139 = vmatprep.mubr.f32.mxu0 %v2377_v0 }
 0x5cb   :  { %1093 = vmatprep.subr.mxu0 %v2498_v15 }
 0x5cc   :  { %1094 = vmatpush1.msra.mxu0 %v2504_v17 }
 0x5cd   :  { %1095 = vmatprep.subr.mxu0 %v2510_v19 }
 0x5ce   :  { %1096 = vmatpush1.msra.mxu0 %v2516_v20 }
 0x5cf   :  { %1097 = vmatprep.subr.mxu0 %v2523_v21 }
 0x5d0   :  { %1098 = vmatpush1.msra.mxu0 %v2529_v23 }
 0x5d1   :  { %1099 = vmatprep.subr.mxu0 %v2536_v25 }
 0x5d2   :  { %1100 = vmatpush1.msra.mxu0 %v2543_v26 }
 0x5d3   :  { %1101 = vmatprep.subr.mxu0 %v2556_v28 }
 0x5d4   :  { %1102 = vmatpush1.msra.mxu0 %v2562_v29 }
 0x5d5   :  { %1103 = vmatprep.subr.mxu0 %v2569_v30 }
 0x5d6   :  { %1104 = vmatpush1.msra.mxu0 %v2577_v31 }
 0x5d7   :  { %1105 = vmatprep.subr.mxu0 %v2584_v32 }
 0x5d8   :  { %1106 = vmatpush1.msra.mxu0 %v2591_v33 }
 0x5d9   :  { %1428 = vmatprep.subr.mxu0 %v2487_v11 }
 0x689   :  { %v788_v14 = vpop.f32.mrf.mxu0 }
 0x68a   :  { %v803_v60 = vadd.f32 %v788_v14, %v2638_v52  ;;  %v794_v3 = vrot.slane %v788_v14, 4  ;;  %v828_v4 = vrot.slane %v788_v14, 6 }
 0x68b   :  { %v790_v34 = vpop.f32.mrf.mxu0 }
 0x68c   :  { %v847_v55 = vadd.f32 %v2549_v27, %v790_v34  ;;  %v805_v63 = vrot.slane %v803_v60, 4  ;;  %v796_v5 = vadd.f32 %v794_v3, %v2644_v61  ;;  %v830_v6 = vadd.f32 %v828_v4, %v2647_v2 }
 0x68d   :  { %v838_v57 = vrot.slane %v790_v34, 6 }
 0x68e   :  { %v849_v1 = vrot.slane %v847_v55, 6  ;;  %806 = vrot.lane.b32.xlu1 %v805_v63, %s2378_s25  ;;  %v1979_v7 = vmul.f32 -1.442695, %v796_v5  ;;  %v1980_v8 = vmul.f32 -1.442695, %v830_v6 }
 0x68f   :  { %v840_v58 = vadd.f32 %v838_v57, %v2636_v51 }
 0x690   :  { %850 = vrot.lane.b32.xlu0 %v849_v1, %s2378_s25  ;;  %2103 = vpow2.f32 %v1979_v7 }
 0x691   :  { %2105 = vpow2.f32 %v1980_v8  ;;  %v1981_v14 = vmul.f32 -1.442695, %v840_v58 }
 0x69d   :  { %v2104_v9 = vpop.eup %2103 }
 0x69e   :  { %v2106_v12 = vpop.eup %2105  ;;  %v800_v16 = vadd.f32 1.0, %v2104_v9 }
 0x69f   :  { %v834_v24 = vadd.f32 1.0, %v2106_v12 }
 0x6a0   :  { %2107 = vrcp.f32 %v800_v16 }
 0x6a1   :  { %2109 = vrcp.f32 %v834_v24 }
 0x6ad   :  { %v2108_v35 = vpop.eup %2107 }
 0x6ae   :  { %v2110_v37 = vpop.eup %2109  ;;  %v816_v1 = vsub.f32 1.0, %v2108_v35 }
 0x700   :  { %v807_v36 = vpop.permute.xlu1 %806 }
 0x701   :  { %v809_v38 = vmul.f32 %v2108_v35, %v807_v36 }
 0x702   :  { %v851_v39 = vpop.permute.xlu0 %850 }
 0x703   :  { %v853_v40 = vmul.f32 %v2110_v37, %v851_v39  ;;  %811 = vrot.lane.b32.xlu1 %v809_v38, %s2378_s25 }
 0x705   :  { %855 = vrot.lane.b32.xlu0 %v853_v40, %s2378_s25 }
 0x709   :  { %823 = vrot.lane.b32.xlu0 %v822_v41, %s2381_s2 }
 0x70d   :  { %867 = vrot.lane.b32.xlu0 %v866_v42, %s2380_s28 }
 0x711   :  { %893 = vrot.lane.b32.xlu0 %v2743_v59, %s2380_s28 }
 0x775   :  { %v812_v22 = vpop.permute.xlu1 %811 }
 0x776   :  { %v814_v43 = vadd.f32 %v812_v22, %v2644_v61 }
 0x777   :  { %v856_v44 = vpop.permute.xlu0 %855 }
 0x778   :  { %2111 = vtanh.f32 %v814_v43  ;;  %v858_v45 = vadd.f32 %v856_v44, %v2636_v51 }
 0x77a   :  { %2113 = vtanh.f32 %v858_v45 }
 0x77b   :  { %2115 = vpow2.f32 %v1981_v14  ;;  %v824_v63 = vpop.permute.xlu0 %823 }
 0x77c   :  { %v826_v4 = vmul.f32 %v2108_v35, %v824_v63 }
 0x77f   :  { %v868_v34 = vpop.permute.xlu0 %867 }
 0x783   :  { %v894_v39 = vpop.permute.xlu0 %893 }
 0x785   :  { %v2112_v46 = vpop.eup %2111 }
 0x786   :  { %818 = vrot.lane.b32.xlu1 %v2112_v46, %s2380_s28 }
 0x787   :  { %v2114_v53 = vpop.eup %2113 }
 0x788   :  { %v2116_v60 = vpop.eup %2115 }
 0x789   :  { %v844_v55 = vadd.f32 1.0, %v2116_v60 }
 0x78a   :  { %862 = vrot.lane.b32.xlu1 %v2114_v53, %s2380_s28 }
 0x78b   :  { %2117 = vrcp.f32 %v844_v55 }
 0x78e   :  { %887 = vperm.xlu1 %2069, %v885_v48  }
 0x792   :  { %875 = vperm.xlu1 %2069, %v873_v56  }
 0x798   :  { %v2118_v7 = vpop.eup %2117 }
 0x799   :  { %v860_v12 = vsub.f32 1.0, %v2118_v7  ;;  %v870_v24 = vmul.f32 %v2118_v7, %v868_v34 }
 0x7f8   :  { %v819_v3 = vpop.permute.xlu1 %818 }
 0x7f9   :  { %v821_v5 = vmul.f32 %v819_v3, %v816_v1 }
 0x7fb   :  { %v827_v6 = vadd.f32 %v826_v4, %v821_v5 }
 0x7fc   :  { %v863_v9 = vpop.permute.xlu1 %862 }
 0x7fd   :  { %v879_v8 = vrot.slane %v827_v6, 4  ;;  %v865_v16 = vmul.f32 %v863_v9, %v860_v12 }
 0x7ff   :  { %880 = vrot.lane.b32.xlu0 %v879_v8, %s2380_s28  ;;  %v871_v36 = vadd.f32 %v870_v24, %v865_v16  ;;  %v1061_v8 = vsel %vm1060_vm15, 1, %v2379_v10 }
 0x801   :  { %v891_v37 = vrot.slane %v871_v36, 2 }
 0x809   :  { %v2788_v38 = vpop.permute.xlu1 %887 }
 0x80a   :  { %vm889_vm13 = vcmp.eq.s32.totalorder %v2788_v38, 1 }
 0x80b   :  { %v896_v35 = vsel %vm889_vm13, %v891_v37, %v894_v39  ;;  %v1049_v39 = vsel %vm1048_vm0, 1, %v2379_v10 }
 0x80c   :  { %898 = vrot.lane.b32.xlu1 %v896_v35, %s2381_s2 }
 0x80d   :  { %v2794_v40 = vpop.permute.xlu1 %875 }
 0x80e   :  { %vm877_vm14 = vcmp.eq.s32.totalorder %v2794_v40, 1 }
 0x871   :  { %v881_v41 = vpop.permute.xlu0 %880 }
 0x872   :  { %v883_v42 = vsel %vm877_vm14, %v881_v41, %v2743_v59 }
 0x87e   :  { %v899_v22 = vpop.permute.xlu1 %898 }
 0x87f   :  { %v2801_v43 = vsel %vm229_vm1, %v883_v42, %v899_v22 }
 0x880   :  { %1982 = vmatmul.mubr.msk.f32.vlgmr.msra.gmra.mxu1 %vm353_vm2, %v2801_v43  ;;  %v1005_v9 = vrot.slane %v2801_v43, 2 }
 0x881   :  { %1258 = vmatpush1.msra.mxu1 %v2492_v13  ;;  %1305 = vmatprep.mubr.f32.mxu1 %v2377_v0 }
 0x882   :  { %1259 = vmatprep.subr.mxu1 %v2498_v15 }
 0x883   :  { %1260 = vmatpush1.msra.mxu1 %v2504_v17 }
 0x884   :  { %1261 = vmatprep.subr.mxu1 %v2510_v19 }
 0x885   :  { %1262 = vmatpush1.msra.mxu1 %v2516_v20 }
 0x886   :  { %1263 = vmatprep.subr.mxu1 %v2523_v21 }
 0x887   :  { %1264 = vmatpush1.msra.mxu1 %v2529_v23 }
 0x888   :  { %1265 = vmatprep.subr.mxu1 %v2536_v25 }
 0x889   :  { %1266 = vmatpush1.msra.mxu1 %v2543_v26 }
 0x88a   :  { %1267 = vmatprep.subr.mxu1 %v2556_v28 }
 0x88b   :  { %1268 = vmatpush1.msra.mxu1 %v2562_v29 }
 0x88c   :  { %1269 = vmatprep.subr.mxu1 %v2569_v30 }
 0x88d   :  { %1270 = vmatpush1.msra.mxu1 %v2577_v31 }
 0x88e   :  { %1271 = vmatprep.subr.mxu1 %v2584_v32 }
 0x88f   :  { %1272 = vmatpush1.msra.mxu1 %v2591_v33 }
 0x890   :  { %1599 = vmatprep.subr.mxu1 %v2487_v11 }
 0x940   :  { %v971_v59 = vpop.f32.mrf.mxu1 }
 0x941   :  { %v986_v44 = vadd.f32 %v971_v59, %v2638_v52  ;;  %v977_v48 = vrot.slane %v971_v59, 2  ;;  %v1011_v56 = vadd.f32 %v971_v59, %v2647_v2 }
 0x942   :  { %v973_v45 = vpop.f32.mrf.mxu1 }
 0x943   :  { %v1025_v46 = vadd.f32 %v2549_v27, %v973_v45  ;;  %v988_v53 = vrot.slane %v986_v44, 2  ;;  %v979_v57 = vadd.f32 %v977_v48, %v2644_v61  ;;  %v1984_v58 = vmul.f32 -1.442695, %v1011_v56 }
 0x944   :  { %v1018_v35 = vadd.f32 %v973_v45, %v2636_v51 }
 0x945   :  { %1027 = vrot.lane.b32.xlu1 %v1025_v46, %s2378_s25  ;;  %989 = vrot.lane.b32.xlu0 %v988_v53, %s2378_s25  ;;  %v1983_v14 = vmul.f32 -1.442695, %v979_v57  ;;  %2119 = vpow2.f32 %v1984_v58 }
 0x946   :  { %v1985_v41 = vmul.f32 -1.442695, %v1018_v35 }
 0x947   :  { %2121 = vpow2.f32 %v1983_v14 }
 0x952   :  { %v2120_v11 = vpop.eup %2119 }
 0x953   :  { %v1015_v55 = vadd.f32 1.0, %v2120_v11 }
 0x954   :  { %v2122_v60 = vpop.eup %2121 }
 0x955   :  { %v983_v63 = vadd.f32 1.0, %v2122_v60  ;;  %2123 = vrcp.f32 %v1015_v55 }
 0x957   :  { %2125 = vrcp.f32 %v983_v63 }
 0x962   :  { %v2124_v1 = vpop.eup %2123 }
 0x964   :  { %v2126_v4 = vpop.eup %2125 }
 0x965   :  { %v999_v44 = vsub.f32 1.0, %v2126_v4 }
 0x9b7   :  { %v1028_v3 = vpop.permute.xlu1 %1027  ;;  %v990_v5 = vpop.permute.xlu0 %989 }
 0x9b8   :  { %v1030_v6 = vmul.f32 %v2124_v1, %v1028_v3  ;;  %v992_v7 = vmul.f32 %v2126_v4, %v990_v5 }
 0x9ba   :  { %1032 = vrot.lane.b32.xlu1 %v1030_v6, %s2378_s25  ;;  %994 = vrot.lane.b32.xlu0 %v992_v7, %s2378_s25 }
 0x9be   :  { %1006 = vrot.lane.b32.xlu1 %v1005_v9, %s2381_s2  ;;  %1063 = vperm.xlu0 %2070, %v1061_v8  }
 0xa2c   :  { %v1033_v12 = vpop.permute.xlu1 %1032  ;;  %v995_v34 = vpop.permute.xlu0 %994 }
 0xa2d   :  { %v1035_v16 = vadd.f32 %v1033_v12, %v2636_v51  ;;  %v997_v24 = vadd.f32 %v995_v34, %v2644_v61 }
 0xa2f   :  { %2127 = vtanh.f32 %v1035_v16 }
 0xa30   :  { %2129 = vtanh.f32 %v997_v24  ;;  %v1007_v59 = vpop.permute.xlu1 %1006 }
 0xa31   :  { %2131 = vpow2.f32 %v1985_v41  ;;  %v1009_v48 = vmul.f32 %v2126_v4, %v1007_v59 }
 0xa39   :  { %v2843_v18 = vpop.permute.xlu0 %1063 }
 0xa3a   :  { %vm1065_vm3 = vcmp.eq.s32.totalorder %v2843_v18, 1  ;;  %v2201_v18 = vld [vmem:[%s3112_s6 + $0x70] sm:$0xff] }
 0xa3c   :  { %v2128_v36 = vpop.eup %2127 }
 0xa3d   :  { %v2130_v37 = vpop.eup %2129  ;;  %1039 = vrot.lane.b32.xlu1 %v2128_v36, %s2380_s28 }
 0xa3e   :  { %1001 = vrot.lane.b32.xlu0 %v2130_v37, %s2380_s28  ;;  %v2132_v42 = vpop.eup %2131 }
 0xa3f   :  { %v1022_v22 = vadd.f32 1.0, %v2132_v42 }
 0xa41   :  { %1051 = vperm.xlu1 %2069, %v1049_v39   ;;  %2133 = vrcp.f32 %v1022_v22 }
 0xa42   :  { %1043 = vrot.lane.b32.xlu0 %v2801_v43, %s2380_s28 }
 0xa4e   :  { %v2134_v46 = vpop.eup %2133 }
 0xa4f   :  { %v1037_v58 = vsub.f32 1.0, %v2134_v46 }
 0xaaf   :  { %v1040_v10 = vpop.permute.xlu1 %1039 }
 0xab0   :  { %v1002_v53 = vpop.permute.xlu0 %1001  ;;  %v1042_v60 = vmul.f32 %v1040_v10, %v1037_v58 }
 0xab1   :  { %v1004_v56 = vmul.f32 %v1002_v53, %v999_v44 }
 0xab3   :  { %v1010_v57 = vadd.f32 %v1009_v48, %v1004_v56 }
 0xab4   :  { %v1044_v14 = vpop.permute.xlu0 %1043 }
 0xab5   :  { %v1055_v11 = vrot.slane %v1010_v57, 6  ;;  %v1046_v51 = vmul.f32 %v2134_v46, %v1044_v14 }
 0xab7   :  { %v1047_v45 = vadd.f32 %v1046_v51, %v1042_v60  ;;  %1056 = vrot.lane.b32.xlu0 %v1055_v11, %s2380_s28 }
 0xab9   :  { %v1066_v55 = vsel %vm1065_vm3, %v1047_v45, %v1044_v14 }
 0xaba   :  { %1068 = vrot.lane.b32.xlu1 %v1066_v55, %s2381_s2 }
 0xabc   :  { %v2850_v63 = vpop.permute.xlu1 %1051 }
 0xabd   :  { %vm1053_vm4 = vcmp.eq.s32.totalorder %v2850_v63, 1  ;;  %v2202_v63 = vld [vmem:[%s3112_s6 + $0x68] sm:$0xff] }
 0xb29   :  { %v1057_v1 = vpop.permute.xlu0 %1056 }
 0xb2a   :  { %v1059_v3 = vsel %vm1053_vm4, %v1057_v1, %v2801_v43 }
 0xb2c   :  { %v1069_v4 = vpop.permute.xlu1 %1068 }
 0xb2d   :  { %v1071_v5 = vsel %vm229_vm1, %v1059_v3, %v1069_v4 }
 0xb2e   :  { %1986 = vmatmul.mubr.msk.f32.vlgmr.msra.gmra.mxu0 %vm353_vm2, %v1071_v5  ;;  %v1215_v9 = vrot.slane %v1071_v5, 2 }
 0xb2f   :  { %1429 = vmatpush1.msra.mxu0 %v2492_v13  ;;  %1476 = vmatprep.mubr.f32.mxu0 %v2377_v0 }
 0xb30   :  { %1430 = vmatprep.subr.mxu0 %v2498_v15 }
 0xb31   :  { %1431 = vmatpush1.msra.mxu0 %v2504_v17 }
 0xb32   :  { %1432 = vmatprep.subr.mxu0 %v2510_v19 }
 0xb33   :  { %1433 = vmatpush1.msra.mxu0 %v2516_v20 }
 0xb34   :  { %1434 = vmatprep.subr.mxu0 %v2523_v21 }
 0xb35   :  { %1435 = vmatpush1.msra.mxu0 %v2529_v23 }
 0xb36   :  { %1436 = vmatprep.subr.mxu0 %v2536_v25 }
 0xb37   :  { %1437 = vmatpush1.msra.mxu0 %v2543_v26 }
 0xb38   :  { %1438 = vmatprep.subr.mxu0 %v2556_v28 }
 0xb39   :  { %1439 = vmatpush1.msra.mxu0 %v2562_v29 }
 0xb3a   :  { %1440 = vmatprep.subr.mxu0 %v2569_v30 }
 0xb3b   :  { %1441 = vmatpush1.msra.mxu0 %v2577_v31 }
 0xb3c   :  { %1442 = vmatprep.subr.mxu0 %v2584_v32 }
 0xb3d   :  { %1443 = vmatpush1.msra.mxu0 %v2591_v33 }
 0xb3e   :  { %2022 = vmatprep.subr.mxu0 %v2377_v0 }
 0xbee   :  { %v1141_v13 = vpop.f32.mrf.mxu0 }
 0xbef   :  { %v1153_v15 = vadd.f32 %v1141_v13, %v2638_v52  ;;  %v1146_v21 = vadd.f32 %v1141_v13, %v2647_v2  ;;  %v1177_v23 = vrot.slane %v1141_v13, 2 }
 0xbf0   :  { %v1143_v17 = vpop.f32.mrf.mxu0 }
 0xbf1   :  { %v1196_v19 = vadd.f32 %v2549_v27, %v1143_v17  ;;  %1155 = vrot.lane.b32.xlu1 %v1153_v15, %s2378_s25  ;;  %v1987_v25 = vmul.f32 -1.442695, %v1146_v21  ;;  %v1179_v26 = vadd.f32 %v1177_v23, %v2644_v61  ;;  %v1187_v39 = vrot.slane %v1143_v17, 2  ;;  %v2203_v15 = vld [vmem:[%s3112_s6 + $0x60] sm:$0xff]  ;;  %v2204_v17 = vld [vmem:[%s3112_s6 + $0x58] sm:$0xff] }
 0xbf2   :  { %v2207_v21 = vld [vmem:[%s3112_s6 + $0x40] sm:$0xff]  ;;  %v2208_v23 = vld [vmem:[%s3112_s6 + $0x38] sm:$0xff] }
 0xbf3   :  { %v1198_v20 = vrot.slane %v1196_v19, 2  ;;  %2135 = vpow2.f32 %v1987_v25  ;;  %v1988_v28 = vmul.f32 -1.442695, %v1179_v26  ;;  %v1189_v35 = vadd.f32 %v1187_v39, %v2634_v47  ;;  %v2205_v19 = vld [vmem:[%s3112_s6 + $0x50] sm:$0xff]  ;;  %v2210_v26 = vld [vmem:[%s3112_s6 + $0x28] sm:$0xff] }
 0xbf4   :  { %v2209_v25 = vld [vmem:[%s3112_s6 + $0x30] sm:$0xff] }
 0xbf5   :  { %1199 = vrot.lane.b32.xlu0 %v1198_v20, %s2378_s25  ;;  %2137 = vpow2.f32 %v1988_v28  ;;  %v1989_v41 = vmul.f32 -1.442695, %v1189_v35  ;;  %v2206_v20 = vld [vmem:[%s3112_s6 + $0x48] sm:$0xff]  ;;  %v2211_v28 = vld [vmem:[%s3112_s6 + $0x20] sm:$0xff] }
 0xc00   :  { %v2136_v29 = vpop.eup %2135 }
 0xc01   :  { %v1150_v30 = vadd.f32 1.0, %v2136_v29  ;;  %v2212_v29 = vld [vmem:[%s3112_s6 + $0x18] sm:$0xff] }
 0xc02   :  { %v2138_v31 = vpop.eup %2137 }
 0xc03   :  { %2139 = vrcp.f32 %v1150_v30  ;;  %v1183_v32 = vadd.f32 1.0, %v2138_v31  ;;  %v2213_v30 = vld [vmem:[%s3112_s6 + $0x10] sm:$0xff]  ;;  %v2214_v31 = vld [vmem:[%s3112_s6 + $0x8] sm:$0xff] }
 0xc05   :  { %2141 = vrcp.f32 %v1183_v32  ;;  %v2215_v32 = vld [vmem:[%s3112_s6] sm:$0xff] }
 0xc10   :  { %v2140_v27 = vpop.eup %2139 }
 0xc11   :  { %v1165_v58 = vsub.f32 1.0, %v2140_v27 }
 0xc12   :  { %v2142_v6 = vpop.eup %2141 }
 0xc63   :  { %v1156_v33 = vpop.permute.xlu1 %1155 }
 0xc64   :  { %v1158_v43 = vmul.f32 %v2140_v27, %v1156_v33 }
 0xc66   :  { %1160 = vrot.lane.b32.xlu1 %v1158_v43, %s2378_s25 }
 0xc67   :  { %v1200_v7 = vpop.permute.xlu0 %1199 }
 0xc68   :  { %v1202_v8 = vmul.f32 %v2142_v6, %v1200_v7  ;;  %v2953_v6 = vld [vmem:[%s3113_s7] ss:$0 sm:$0xff] }
 0xc6a   :  { %1216 = vrot.lane.b32.xlu1 %v1215_v9, %s2380_s28  ;;  %1204 = vrot.lane.b32.xlu0 %v1202_v8, %s2378_s25 }
 0xc6e   :  { %1171 = vrot.lane.b32.xlu1 %v1071_v5, %s2381_s2 }
 0xcd8   :  { %v1161_v12 = vpop.permute.xlu1 %1160 }
 0xcd9   :  { %v1163_v24 = vadd.f32 %v1161_v12, %v2647_v2 }
 0xcdc   :  { %v1205_v34 = vpop.permute.xlu0 %1204  ;;  %v1217_v44 = vpop.permute.xlu1 %1216 }
 0xcdd   :  { %v1207_v16 = vadd.f32 %v1205_v34, %v2634_v47 }
 0xcdf   :  { %2143 = vtanh.f32 %v1207_v16 }
 0xce0   :  { %2145 = vtanh.f32 %v1163_v24  ;;  %v1172_v10 = vpop.permute.xlu1 %1171 }
 0xce1   :  { %2147 = vpow2.f32 %v1989_v41  ;;  %v1174_v11 = vmul.f32 %v2140_v27, %v1172_v10 }
 0xcec   :  { %v2144_v36 = vpop.eup %2143 }
 0xced   :  { %1211 = vrot.lane.b32.xlu0 %v2144_v36, %s2380_s28  ;;  %v2146_v37 = vpop.eup %2145 }
 0xcee   :  { %v2148_v42 = vpop.eup %2147 }
 0xcef   :  { %v1193_v22 = vadd.f32 1.0, %v2148_v42 }
 0xcf1   :  { %1167 = vrot.lane.b32.xlu0 %v2146_v37, %s2380_s28  ;;  %2149 = vrcp.f32 %v1193_v22 }
 0xcf5   :  { %1225 = vrot.lane.b32.xlu0 %v1071_v5, %s2380_s28 }
 0xcfe   :  { %v2150_v59 = vpop.eup %2149 }
 0xcff   :  { %v1209_v46 = vsub.f32 1.0, %v2150_v59  ;;  %v1219_v48 = vmul.f32 %v2150_v59, %v1217_v44 }
 0xd5f   :  { %v1212_v53 = vpop.permute.xlu0 %1211 }
 0xd60   :  { %v1214_v56 = vmul.f32 %v1212_v53, %v1209_v46 }
 0xd62   :  { %v1220_v57 = vadd.f32 %v1219_v48, %v1214_v56 }
 0xd63   :  { %v1168_v14 = vpop.permute.xlu0 %1167 }
 0xd64   :  { %v1170_v60 = vmul.f32 %v1168_v14, %v1165_v58  ;;  %v1223_v51 = vrot.slane %v1220_v57, 6 }
 0xd66   :  { %v1175_v45 = vadd.f32 %v1174_v11, %v1170_v60 }
 0xd67   :  { %v1226_v55 = vpop.permute.xlu0 %1225 }
 0xd68   :  { %v1221_v1 = vsel %vm1065_vm3, %v1175_v45, %v1172_v10  ;;  %v1228_v3 = vsel %vm1053_vm4, %v1223_v51, %v1226_v55 }
 0xd69   :  { %1230 = vrot.lane.b32.xlu1 %v1221_v1, %s2380_s28  ;;  %1234 = vrot.lane.b32.xlu0 %v1228_v3, %s2381_s2 }
 0xddb   :  { %v1231_v4 = vpop.permute.xlu1 %1230  ;;  %v1235_v5 = vpop.permute.xlu0 %1234 }
 0xddc   :  { %v2898_v13 = vsel %vm229_vm1, %v1231_v4, %v1235_v5 }
 0xddd   :  { %1990 = vmatmul.mubr.msk.f32.vlgmr.msra.gmra.mxu1 %vm353_vm2, %v2898_v13  ;;  %v1341_v56 = vrot.slane %v2898_v13, 6  ;;  %v1385_v10 = vrot.slane %v2898_v13, 4 }
 0xdde   :  { %1600 = vmatpush1.msra.mxu1 %v2201_v18  ;;  %1647 = vmatprep.mubr.f32.mxu1 %v2377_v0 }
 0xddf   :  { %1601 = vmatprep.subr.mxu1 %v2202_v63 }
 0xde0   :  { %1602 = vmatpush1.msra.mxu1 %v2203_v15 }
 0xde1   :  { %1603 = vmatprep.subr.mxu1 %v2204_v17 }
 0xde2   :  { %1604 = vmatpush1.msra.mxu1 %v2205_v19 }
 0xde3   :  { %1605 = vmatprep.subr.mxu1 %v2206_v20 }
 0xde4   :  { %1606 = vmatpush1.msra.mxu1 %v2207_v21 }
 0xde5   :  { %1607 = vmatprep.subr.mxu1 %v2208_v23 }
 0xde6   :  { %1608 = vmatpush1.msra.mxu1 %v2209_v25 }
 0xde7   :  { %1609 = vmatprep.subr.mxu1 %v2210_v26 }
 0xde8   :  { %1610 = vmatpush1.msra.mxu1 %v2211_v28 }
 0xde9   :  { %1611 = vmatprep.subr.mxu1 %v2212_v29 }
 0xdea   :  { %1612 = vmatpush1.msra.mxu1 %v2213_v30 }
 0xdeb   :  { %1613 = vmatprep.subr.mxu1 %v2214_v31 }
 0xdec   :  { %1614 = vmatpush1.msra.mxu1 %v2215_v32 }
 0xded   :  { %2041 = vmatprep.subr.mxu1 %v2377_v0 }
 0xe9d   :  { %v1307_v27 = vpop.f32.mrf.mxu1 }
 0xe9e   :  { %v1322_v33 = vadd.f32 %v1307_v27, %v2638_v52  ;;  %v1313_v12 = vrot.slane %v1307_v27, 6  ;;  %v1347_v34 = vrot.slane %v1307_v27, 4 }
 0xe9f   :  { %v1309_v43 = vpop.f32.mrf.mxu1 }
 0xea0   :  { %v1366_v7 = vadd.f32 %v2953_v6, %v1309_v43  ;;  %v1324_v8 = vrot.slane %v1322_v33, 6  ;;  %v1315_v16 = vadd.f32 %v1313_v12, %v2647_v2  ;;  %v1349_v24 = vadd.f32 %v1347_v34, %v2644_v61 }
 0xea1   :  { %v1357_v45 = vrot.slane %v1309_v43, 4 }
 0xea2   :  { %v1368_v9 = vrot.slane %v1366_v7, 4  ;;  %1325 = vrot.lane.b32.xlu1 %v1324_v8, %s2378_s25  ;;  %v1991_v36 = vmul.f32 -1.442695, %v1315_v16  ;;  %v1992_v37 = vmul.f32 -1.442695, %v1349_v24 }
 0xea3   :  { %v1359_v55 = vadd.f32 %v1357_v45, %v2634_v47 }
 0xea4   :  { %1369 = vrot.lane.b32.xlu0 %v1368_v9, %s2378_s25  ;;  %2151 = vpow2.f32 %v1991_v36 }
 0xea5   :  { %2153 = vpow2.f32 %v1992_v37  ;;  %v1993_v1 = vmul.f32 -1.442695, %v1359_v55 }
 0xeb1   :  { %v2152_v39 = vpop.eup %2151 }
 0xeb2   :  { %v2154_v35 = vpop.eup %2153  ;;  %v1319_v41 = vadd.f32 1.0, %v2152_v39 }
 0xeb3   :  { %v1353_v42 = vadd.f32 1.0, %v2154_v35 }
 0xeb4   :  { %2155 = vrcp.f32 %v1319_v41 }
 0xeb5   :  { %2157 = vrcp.f32 %v1353_v42 }
 0xec1   :  { %v2156_v22 = vpop.eup %2155 }
 0xec2   :  { %v2158_v44 = vpop.eup %2157  ;;  %v1335_v18 = vsub.f32 1.0, %v2156_v22 }
 0xf14   :  { %v1326_v59 = vpop.permute.xlu1 %1325 }
 0xf15   :  { %v1328_v46 = vmul.f32 %v2156_v22, %v1326_v59 }
 0xf16   :  { %v1370_v53 = vpop.permute.xlu0 %1369 }
 0xf17   :  { %v1372_v48 = vmul.f32 %v2158_v44, %v1370_v53  ;;  %1330 = vrot.lane.b32.xlu1 %v1328_v46, %s2378_s25 }
 0xf19   :  { %1374 = vrot.lane.b32.xlu0 %v1372_v48, %s2378_s25 }
 0xf1d   :  { %1342 = vrot.lane.b32.xlu0 %v1341_v56, %s2381_s2 }
 0xf21   :  { %1386 = vrot.lane.b32.xlu0 %v1385_v10, %s2380_s28 }
 0xf89   :  { %v1331_v57 = vpop.permute.xlu1 %1330 }
 0xf8a   :  { %v1333_v58 = vadd.f32 %v1331_v57, %v2647_v2 }
 0xf8b   :  { %v1375_v14 = vpop.permute.xlu0 %1374 }
 0xf8c   :  { %2159 = vtanh.f32 %v1333_v58  ;;  %v1377_v11 = vadd.f32 %v1375_v14, %v2634_v47 }
 0xf8e   :  { %2161 = vtanh.f32 %v1377_v11 }
 0xf8f   :  { %2163 = vpow2.f32 %v1993_v1  ;;  %v1343_v5 = vpop.permute.xlu0 %1342 }
 0xf90   :  { %v1345_v17 = vmul.f32 %v2156_v22, %v1343_v5 }
 0xf93   :  { %v1387_v20 = vpop.permute.xlu0 %1386 }
 0xf99   :  { %v2160_v60 = vpop.eup %2159 }
 0xf9a   :  { %1337 = vrot.lane.b32.xlu1 %v2160_v60, %s2380_s28 }
 0xf9b   :  { %v2162_v51 = vpop.eup %2161 }
 0xf9c   :  { %v2164_v3 = vpop.eup %2163 }
 0xf9d   :  { %v1363_v4 = vadd.f32 1.0, %v2164_v3 }
 0xf9e   :  { %1381 = vrot.lane.b32.xlu1 %v2162_v51, %s2380_s28 }
 0xf9f   :  { %2165 = vrcp.f32 %v1363_v4 }
 0xfa2   :  { %1400 = vrot.lane.b32.xlu1 %v2898_v13, %s2380_s28 }
 0xfac   :  { %v2166_v63 = vpop.eup %2165 }
 0xfad   :  { %v1379_v23 = vsub.f32 1.0, %v2166_v63  ;;  %v1389_v26 = vmul.f32 %v2166_v63, %v1387_v20 }
0x100c   :  { %v1338_v15 = vpop.permute.xlu1 %1337 }
0x100d   :  { %v1340_v19 = vmul.f32 %v1338_v15, %v1335_v18 }
0x100f   :  { %v1346_v21 = vadd.f32 %v1345_v17, %v1340_v19 }
0x1010   :  { %v1382_v25 = vpop.permute.xlu1 %1381 }
0x1011   :  { %v1392_v28 = vrot.slane %v1346_v21, 2  ;;  %v1384_v29 = vmul.f32 %v1382_v25, %v1379_v23 }
0x1013   :  { %v1390_v30 = vadd.f32 %v1389_v26, %v1384_v29  ;;  %1393 = vrot.lane.b32.xlu0 %v1392_v28, %s2380_s28 }
0x1014   :  { %v1401_v32 = vpop.permute.xlu1 %1400 }
0x1015   :  { %v1398_v31 = vrot.slane %v1390_v30, 4 }
0x1017   :  { %v1403_v27 = vsel %vm877_vm14, %v1398_v31, %v1401_v32 }
0x1018   :  { %1405 = vrot.lane.b32.xlu1 %v1403_v27, %s2381_s2 }
0x1085   :  { %v1394_v33 = vpop.permute.xlu0 %1393 }
0x1086   :  { %v1396_v43 = vsel %vm889_vm13, %v1394_v33, %v2898_v13 }
0x108a   :  { %v1406_v7 = vpop.permute.xlu1 %1405 }
0x108b   :  { %v2981_v8 = vsel %vm229_vm1, %v1396_v43, %v1406_v7 }
0x108c   :  { %1994 = vmatmul.mubr.msk.f32.vlgmr.msra.gmra.mxu0 %vm353_vm2, %v2981_v8  ;;  %v1512_v57 = vrot.slane %v2981_v8, 4  ;;  %v1556_v58 = vrot.slane %v2981_v8, 6 }
0x108d   :  { %2038 = vmatprep.mubr.msk.f32.mxu0 %vm2382_vm7, %v2377_v0 }
0x114c   :  { %v1478_v9 = vpop.f32.mrf.mxu0 }
0x114d   :  { %v1493_v12 = vadd.f32 %v1478_v9, %v2638_v52  ;;  %v1484_v38 = vrot.slane %v1478_v9, 4  ;;  %v1518_v13 = vrot.slane %v1478_v9, 6 }
0x114e   :  { %v1480_v34 = vpop.f32.mrf.mxu0 }
0x114f   :  { %v1537_v40 = vadd.f32 %v2953_v6, %v1480_v34  ;;  %v1495_v16 = vrot.slane %v1493_v12, 4  ;;  %v1486_v36 = vadd.f32 %v1484_v38, %v2647_v2  ;;  %v1520_v37 = vadd.f32 %v1518_v13, %v2644_v61 }
0x1150   :  { %v1528_v1 = vrot.slane %v1480_v34, 6 }
0x1151   :  { %v1539_v24 = vrot.slane %v1537_v40, 6  ;;  %1496 = vrot.lane.b32.xlu0 %v1495_v16, %s2378_s25  ;;  %v1995_v39 = vmul.f32 -1.442695, %v1486_v36  ;;  %v1996_v35 = vmul.f32 -1.442695, %v1520_v37 }
0x1152   :  { %v1530_v3 = vadd.f32 %v1528_v1, %v2634_v47 }
0x1153   :  { %1540 = vrot.lane.b32.xlu1 %v1539_v24, %s2378_s25  ;;  %2167 = vpow2.f32 %v1995_v39 }
0x1154   :  { %2169 = vpow2.f32 %v1996_v35  ;;  %v1997_v4 = vmul.f32 -1.442695, %v1530_v3 }
0x1160   :  { %v2168_v41 = vpop.eup %2167 }
0x1161   :  { %v2170_v42 = vpop.eup %2169  ;;  %v1490_v22 = vadd.f32 1.0, %v2168_v41 }
0x1162   :  { %v1524_v59 = vadd.f32 1.0, %v2170_v42 }
0x1163   :  { %2171 = vrcp.f32 %v1490_v22 }
0x1164   :  { %2173 = vrcp.f32 %v1524_v59 }
0x1170   :  { %v2172_v44 = vpop.eup %2171 }
0x1171   :  { %v2174_v53 = vpop.eup %2173  ;;  %v1506_v15 = vsub.f32 1.0, %v2172_v44 }
0x11c3   :  { %v1497_v46 = vpop.permute.xlu0 %1496 }
0x11c4   :  { %v1499_v48 = vmul.f32 %v2172_v44, %v1497_v46 }
0x11c5   :  { %v1541_v56 = vpop.permute.xlu1 %1540 }
0x11c6   :  { %v1543_v10 = vmul.f32 %v2174_v53, %v1541_v56  ;;  %1501 = vrot.lane.b32.xlu0 %v1499_v48, %s2378_s25 }
0x11c8   :  { %1545 = vrot.lane.b32.xlu1 %v1543_v10, %s2378_s25 }
0x11cc   :  { %1513 = vrot.lane.b32.xlu1 %v1512_v57, %s2381_s2  ;;  %v1745_v57 = vld [vmem:[%s3115_s9 + $0x38] sm:$0xff] }
0x11cd   :  { %2023 = vmatpush3.msra.mxu0 %v1745_v57 }
0x11ce   :  { %2024 = vmatprep.subr.mxu0 %v2377_v0 }
0x11d0   :  { %1557 = vrot.lane.b32.xlu1 %v1556_v58, %s2380_s28  ;;  %v1744_v58 = vld [vmem:[%s3115_s9 + $0x30] sm:$0xff] }
0x11d1   :  { %2025 = vmatpush3.msra.mxu0 %v1744_v58 }
0x11d2   :  { %2026 = vmatprep.subr.mxu0 %v2377_v0 }
0x1238   :  { %v1502_v14 = vpop.permute.xlu0 %1501 }
0x1239   :  { %v1504_v11 = vadd.f32 %v1502_v14, %v2647_v2  ;;  %v1743_v14 = vld [vmem:[%s3115_s9 + $0x28] sm:$0xff] }
0x123a   :  { %v1546_v60 = vpop.permute.xlu1 %1545  ;;  %2027 = vmatpush3.msra.mxu0 %v1743_v14 }
0x123b   :  { %2175 = vtanh.f32 %v1504_v11  ;;  %v1548_v51 = vadd.f32 %v1546_v60, %v2634_v47  ;;  %v1742_v11 = vld [vmem:[%s3115_s9 + $0x20] sm:$0xff]  ;;  %2028 = vmatprep.subr.mxu0 %v2377_v0  ;;  %v1741_v60 = vld [vmem:[%s3115_s9 + $0x18] sm:$0xff] }
0x123c   :  { %2029 = vmatpush3.msra.mxu0 %v1742_v11 }
0x123d   :  { %2177 = vtanh.f32 %v1548_v51  ;;  %2030 = vmatprep.subr.mxu0 %v2377_v0 }
0x123e   :  { %2179 = vpow2.f32 %v1997_v4  ;;  %v1514_v63 = vpop.permute.xlu1 %1513  ;;  %2031 = vmatpush3.msra.mxu0 %v1741_v60 }
0x123f   :  { %v1516_v20 = vmul.f32 %v2172_v44, %v1514_v63  ;;  %2032 = vmatprep.subr.mxu0 %v2377_v0  ;;  %v1738_v63 = vld [vmem:[%s3115_s9] sm:$0xff] }
0x1242   :  { %v1558_v23 = vpop.permute.xlu1 %1557 }
0x1248   :  { %v2176_v45 = vpop.eup %2175 }
0x1249   :  { %1508 = vrot.lane.b32.xlu0 %v2176_v45, %s2380_s28  ;;  %v1740_v45 = vld [vmem:[%s3115_s9 + $0x10] sm:$0xff] }
0x124a   :  { %v2178_v55 = vpop.eup %2177  ;;  %2033 = vmatpush3.msra.mxu0 %v1740_v45 }
0x124b   :  { %v2180_v5 = vpop.eup %2179  ;;  %2034 = vmatprep.subr.mxu0 %v2377_v0 }
0x124c   :  { %v1534_v18 = vadd.f32 1.0, %v2180_v5  ;;  %v1739_v5 = vld [vmem:[%s3115_s9 + $0x8] sm:$0xff] }
0x124d   :  { %1552 = vrot.lane.b32.xlu0 %v2178_v55, %s2380_s28  ;;  %2035 = vmatpush3.msra.mxu0 %v1739_v5 }
0x124e   :  { %2181 = vrcp.f32 %v1534_v18  ;;  %2036 = vmatprep.subr.mxu0 %v2377_v0 }
0x124f   :  { %2037 = vmatpush3.msra.mxu0 %v1738_v63 }
0x1251   :  { %1571 = vrot.lane.b32.xlu0 %v2981_v8, %s2380_s28 }
0x125b   :  { %v2182_v17 = vpop.eup %2181 }
0x125c   :  { %v1550_v26 = vsub.f32 1.0, %v2182_v17  ;;  %v1560_v29 = vmul.f32 %v2182_v17, %v1558_v23 }
0x12bb   :  { %v1509_v19 = vpop.permute.xlu0 %1508 }
0x12bc   :  { %v1511_v21 = vmul.f32 %v1509_v19, %v1506_v15 }
0x12be   :  { %v1517_v25 = vadd.f32 %v1516_v20, %v1511_v21 }
0x12bf   :  { %v1553_v28 = vpop.permute.xlu0 %1552 }
0x12c0   :  { %v1563_v30 = vrot.slane %v1517_v25, 4  ;;  %v1555_v31 = vmul.f32 %v1553_v28, %v1550_v26 }
0x12c2   :  { %v1561_v32 = vadd.f32 %v1560_v29, %v1555_v31  ;;  %1564 = vrot.lane.b32.xlu1 %v1563_v30, %s2380_s28 }
0x12c3   :  { %v1572_v33 = vpop.permute.xlu0 %1571 }
0x12c4   :  { %v1569_v27 = vrot.slane %v1561_v32, 2 }
0x12c6   :  { %v1574_v43 = vsel %vm694_vm10, %v1569_v27, %v1572_v33 }
0x12c7   :  { %1576 = vrot.lane.b32.xlu0 %v1574_v43, %s2381_s2 }
0x1334   :  { %v1565_v7 = vpop.permute.xlu1 %1564 }
0x1335   :  { %v1567_v9 = vsel %vm706_vm9, %v1565_v7, %v2981_v8 }
0x1339   :  { %v1577_v12 = vpop.permute.xlu0 %1576 }
0x133a   :  { %v3012_v34 = vsel %vm229_vm1, %v1567_v9, %v1577_v12  ;;  %v2002_v9 = vld [vmem:[%s3116_s10] ss:$0 sm:$0xff] }
0x133b   :  { %1998 = vmatmul.mubr.msk.f32.vlgmr.msra.gmra.mxu1 %vm353_vm2, %v3012_v34 }
0x133c   :  { %2049 = vmatprep.mubr.msk.f32.mxu1 %vm2382_vm7, %v2377_v0 }
0x13fb   :  { %v1649_v40 = vpop.f32.mrf.mxu1 }
0x13fc   :  { %v1664_v16 = vadd.f32 %v1649_v40, %v2638_v52  ;;  %v1655_v49 = vrot.slane %v1649_v40, 2  ;;  %v1689_v8 = vadd.f32 %v1649_v40, %v2644_v61  ;;  %v1683_v61 = vrot.slane %v3012_v34, 2 }
0x13fd   :  { %v1651_v24 = vpop.f32.mrf.mxu1 }
0x13fe   :  { %v1703_v54 = vadd.f32 %v2953_v6, %v1651_v24  ;;  %v1666_v38 = vrot.slane %v1664_v16, 2  ;;  %v1657_v13 = vadd.f32 %v1655_v49, %v2647_v2  ;;  %v2000_v36 = vmul.f32 -1.442695, %v1689_v8  ;;  %v1863_v49 = vld [vmem:[%s3119_s13 + $0x18] sm:$0xff]  ;;  %v1862_v8 = vld [vmem:[%s3119_s13 + $0x10] sm:$0xff] }
0x13ff   :  { %v1696_v55 = vadd.f32 %v1651_v24, %v2634_v47  ;;  %2042 = vmatpush3.msra.mxu1 %v1863_v49 }
0x1400   :  { %1705 = vrot.lane.b32.xlu0 %v1703_v54, %s2378_s25  ;;  %1667 = vrot.lane.b32.xlu1 %v1666_v38, %s2378_s25  ;;  %v1999_v37 = vmul.f32 -1.442695, %v1657_v13  ;;  %2183 = vpow2.f32 %v2000_v36  ;;  %v1861_v13 = vld [vmem:[%s3119_s13 + $0x8] sm:$0xff]  ;;  %v1860_v36 = vld [vmem:[%s3119_s13] sm:$0xff] }
0x1401   :  { %v2001_v1 = vmul.f32 -1.442695, %v1696_v55  ;;  %2043 = vmatprep.subr.mxu1 %v2377_v0 }
0x1402   :  { %2185 = vpow2.f32 %v1999_v37  ;;  %2044 = vmatpush3.msra.mxu1 %v1862_v8 }
0x1403   :  { %2045 = vmatprep.subr.mxu1 %v2377_v0 }
0x1404   :  { %2046 = vmatpush3.msra.mxu1 %v1861_v13 }
0x1405   :  { %2047 = vmatprep.subr.mxu1 %v2377_v0 }
0x1406   :  { %2048 = vmatpush3.msra.mxu1 %v1860_v36 }
0x140d   :  { %v2184_v39 = vpop.eup %2183 }
0x140e   :  { %v1693_v52 = vadd.f32 1.0, %v2184_v39 }
0x140f   :  { %v2186_v35 = vpop.eup %2185 }
0x1410   :  { %v1661_v41 = vadd.f32 1.0, %v2186_v35  ;;  %2187 = vrcp.f32 %v1693_v52 }
0x1412   :  { %2189 = vrcp.f32 %v1661_v41  ;;  %v2004_v41 = vld [vmem:[%s3117_s11] ss:$0 sm:$0xff]  ;;  %s2337_s11 = scalar_lea.vmem %s1953_s0, 32 }
0x1413   :  { %p2338_p2 = scmp.ne.s32.totalorder %s1953_s0, %s2337_s11  ;;  %p2343_p4 = scmp.lt.s32.totalorder %s2337_s11, %s2337_s11 }
0x1415   :  { %p2344_p5 = por %p2343_p4, %p2342_p3 }
0x1417   :  { %p2345_p6 = pnand %p2344_p5, %p2338_p2 }
0x141d   :  { %v2188_v6 = vpop.eup %2187 }
0x141f   :  { %v2190_v22 = vpop.eup %2189 }
0x1472   :  { %v1706_v42 = vpop.permute.xlu0 %1705  ;;  %v1668_v59 = vpop.permute.xlu1 %1667 }
0x1473   :  { %v1708_v44 = vmul.f32 %v2188_v6, %v1706_v42  ;;  %v1670_v46 = vmul.f32 %v2190_v22, %v1668_v59  ;;  %v2005_v42 = vld [vmem:[%s3118_s12] ss:$0 sm:$0xff] }
0x1475   :  { %1710 = vrot.lane.b32.xlu0 %v1708_v44, %s2378_s25  ;;  %1672 = vrot.lane.b32.xlu1 %v1670_v46, %s2378_s25  ;;  %v2006_v46 = vld [vmem:[%s3120_s14] ss:$0 sm:$0xff] }
0x1479   :  { %1684 = vrot.lane.b32.xlu0 %v1683_v61, %s2381_s2 }
0x147d   :  { %1721 = vrot.lane.b32.xlu0 %v3012_v34, %s2380_s28 }
0x14e7   :  { %v1673_v53 = vpop.permute.xlu1 %1672  ;;  %v1711_v48 = vpop.permute.xlu0 %1710 }
0x14e8   :  { %v1675_v56 = vadd.f32 %v1673_v53, %v2647_v2  ;;  %v1713_v10 = vadd.f32 %v1711_v48, %v2634_v47  ;;  %v1677_v47 = vsub.f32 1.0, %v2190_v22 }
0x14ea   :  { %2191 = vtanh.f32 %v1675_v56 }
0x14eb   :  { %2193 = vtanh.f32 %v1713_v10  ;;  %v1685_v18 = vpop.permute.xlu0 %1684 }
0x14ec   :  { %2195 = vpow2.f32 %v2001_v1  ;;  %v1687_v19 = vmul.f32 %v2190_v22, %v1685_v18 }
0x14ef   :  { %v1722_v21 = vpop.permute.xlu0 %1721 }
0x14f7   :  { %v2192_v2 = vpop.eup %2191 }
0x14f8   :  { %1679 = vrot.lane.b32.xlu1 %v2192_v2, %s2380_s28  ;;  %v2194_v51 = vpop.eup %2193 }
0x14f9   :  { %v2196_v3 = vpop.eup %2195 }
0x14fa   :  { %v1700_v4 = vadd.f32 1.0, %v2196_v3 }
0x14fc   :  { %1717 = vrot.lane.b32.xlu1 %v2194_v51, %s2380_s28  ;;  %2197 = vrcp.f32 %v1700_v4 }
0x1509   :  { %v2198_v15 = vpop.eup %2197 }
0x150a   :  { %v1715_v25 = vsub.f32 1.0, %v2198_v15  ;;  %v1724_v28 = vmul.f32 %v2198_v15, %v1722_v21 }
0x156a   :  { %v1680_v17 = vpop.permute.xlu1 %1679 }
0x156b   :  { %v1682_v20 = vmul.f32 %v1680_v17, %v1677_v47 }
0x156d   :  { %v1688_v23 = vadd.f32 %v1687_v19, %v1682_v20 }
0x156e   :  { %v1718_v26 = vpop.permute.xlu1 %1717 }
0x156f   :  { %v1727_v29 = vrot.slane %v1688_v23, 6  ;;  %v1720_v30 = vmul.f32 %v1718_v26, %v1715_v25 }
0x1571   :  { %v1725_v31 = vadd.f32 %v1724_v28, %v1720_v30  ;;  %1728 = vrot.lane.b32.xlu1 %v1727_v29, %s2380_s28 }
0x1573   :  { %v1732_v32 = vsel %vm515_vm6, %v1725_v31, %v1722_v21 }
0x1574   :  { %1734 = vrot.lane.b32.xlu0 %v1732_v32, %s2381_s2 }
0x15e3   :  { %v1729_v27 = vpop.permute.xlu1 %1728 }
0x15e4   :  { %v1731_v33 = vsel %vm522_vm5, %v1729_v27, %v3012_v34  ;;  %vm1944_vm5 = vcmask 123904  }
0x15e6   :  { %v1735_v43 = vpop.permute.xlu0 %1734 }
0x15e7   :  { %v1737_v7 = vsel %vm229_vm1, %v1731_v33, %v1735_v43 }
0x15e8   :  { %2039 = vmatmul.mubr.msk.f32.vlgmr.msra.gmra.mxu0 %vm353_vm2, %v1737_v7 }
0x16a8   :  { %v1822_v12 = vpop.f32.mrf.mxu0 }
0x16a9   :  { %v1823_v50 = vadd.f32 %v2002_v9, %v1822_v12 }
0x16aa   :  { %v2040_v40 = vpop.f32.mrf.mxu0 }
0x16ab   :  { %v1827_v16 = vsel %vm1826_vm8, %v1823_v50, 0.0 }
0x16ac   :  { %1828 = vadd.xlane.f32.xlu1 %v1827_v16 }
0x1735   :  { %v1829_v24 = vpop.xlane.xlu1 %1828 }
0x1736   :  { %v1831_v54 = vmul.f32 0.03125, %v1829_v24 }
0x1738   :  { %v1832_v38 = vsub.f32 %v1823_v50, %v1831_v54 }
0x173a   :  { %v1833_v62 = vmul.f32 %v1832_v38, %v1832_v38 }
0x173c   :  { %v1834_v34 = vsel %vm1826_vm8, %v1833_v62, 0.0 }
0x173d   :  { %1835 = vadd.xlane.f32.xlu0 %v1834_v34 }
0x17c6   :  { %v1836_v37 = vpop.xlane.xlu0 %1835 }
0x17c7   :  { %v1837_v39 = vmul.f32 0.03125, %v1836_v37 }
0x17c9   :  { %v1838_v35 = vadd.f32 1e-05, %v1837_v39 }
0x17cb   :  { %2199 = vrsqrt.f32 %v1838_v35 }
0x17d8   :  { %v2200_v52 = vpop.eup %2199 }
0x17d9   :  { %v1840_v6 = vmul.f32 %v2200_v52, %v1832_v38 }
0x17db   :  { %v1848_v22 = vmul.f32 %v2004_v41, %v1840_v6 }
0x17dd   :  { %v1856_v59 = vadd.f32 %v2005_v42, %v1848_v22 }
0x17df   :  { %vm1857_vm2 = vcmp.ge.f32.partialorder %v1856_v59, 0.0  ;;  %v1858_v44 = vmul.f32 0.2, %v1856_v59 }
0x17e1   :  { %v1859_v0 = vsel %vm1857_vm2, %v1856_v59, %v1858_v44 }
0x17e2   :  { %2050 = vmatmul.mubr.msk.f32.vlgmr.msra.gmra.mxu1 %vm229_vm1, %v1859_v0 }
0x18a2   :  { %v1940_v61 = vpop.f32.mrf.mxu1 }
0x18a3   :  { %v1941_v53 = vadd.f32 %v2006_v46, %v1940_v61 }
0x18a4   :  { %v2051_v48 = vpop.f32.mrf.mxu1 }
0x18a5   :  { %1945 = vst.msk [vmem:[#allocation13] sm:$0x3] %vm1944_vm5, %v1941_v53 }
0x18a6   :  { %2348 = shalt.err (!%p2345_p6)
}
0x18a7   :  { %1955 = dma.vmem_to_hbm [thread:$0]  %s1953_s0, 32, %s3121_s15, [#allocation4]  }
0x18a8   :  { %2365 = dma.done.wait [#allocation4], 32  }
0x18a9   :  { %2366 = vsyncadd [#allocation4], 4294967264 }
0x18aa   :  { %1959 = vsyncpa [#allocation3], 1 }
0x18ab   :  { %1960 = vsyncpa [#allocation6], 1 }
0x18ac   :  { %1961 = vsyncpa [#allocation9], 1 }
0x18ad   :  { %1962 = vsyncpa [#allocation12], 1 }
0x18ae   :  { %1963 = vsyncpa [#allocation4], 1 }

</bundles_post_ra>
